<compile_context>
chip_gen: v6e
topology: v6e:2x2x1
jax: 0.10.0
libtpu: 0.0.40
codegen_flags: <defaults>
</compile_context>

<pallas_src>
import functools

import jax
import jax.numpy as jnp
from jax import lax
from jax.experimental import pallas as pl
from jax.experimental.pallas import tpu as pltpu


def _round_up(x, m):
    return ((x + m - 1) // m) * m


def _gru_recurrent_kernel(pre_ref, wh_ur_ref, wh_c_ref, h_out_ref, h_scr,
                          *, hp, t_chunk, seq_len, seq_pad):
    """grid = (batch_tiles, time_chunks); one invocation runs t_chunk steps."""
    tc = pl.program_id(1)
    n_tc = pl.num_programs(1)

    # New batch tile -> reset the resident hidden state.
    @pl.when(tc == 0)
    def _():
        h_scr[...] = jnp.zeros_like(h_scr)

    # Weights are grid-invariant blocks; load once per invocation (hoisted out of
    # the inner loop so no per-step VMEM loads / broadcasts inside fori_loop).
    wh_ur = wh_ur_ref[...]          # (Hp, 2*Hp)  fused [Whu | Whr]
    wh_c = wh_c_ref[...]            # (Hp, Hp)

    def step(t, h):
        pre = pre_ref[t]            # (TB, 3*Hp): x@Wx + b, biases already folded
        ur = jnp.dot(h, wh_ur, preferred_element_type=jnp.float32)   # (TB, 2*Hp)
        u = jax.nn.sigmoid(pre[:, :hp] + ur[:, :hp])
        r = jax.nn.sigmoid(pre[:, hp:2 * hp] + ur[:, hp:])
        c = jnp.tanh(pre[:, 2 * hp:]
                     + jnp.dot(r * h, wh_c, preferred_element_type=jnp.float32))
        h_new = (1.0 - u) * h + u * c
        if seq_pad != seq_len:
            # Mask padded timesteps (only emitted when S was padded up).
            g = tc * t_chunk + t
            h_new = jnp.where(g < seq_len, h_new, h)
        return h_new

    h = lax.fori_loop(0, t_chunk, step, h_scr[...], unroll=True)
    h_scr[...] = h

    @pl.when(tc == n_tc - 1)
    def _():
        h_out_ref[...] = h


def gru_forward(inputs, params, *, t_chunk_max=16):
    """inputs: (B, S, D) float32. Returns final hidden state (B, H)."""
    B, S, D = inputs.shape
    H = params["bu"].shape[-1]
    f32 = jnp.float32

    # Padded / tiled dims: lanes (128) for H, sublanes (8) for B.
    Hp = _round_up(H, 128)
    Bp = _round_up(B, 8)
    TB = Bp if Bp <= 128 else 128
    Bp = _round_up(Bp, TB)
    n_btiles = Bp // TB

    T = min(S, t_chunk_max)
    n_chunks = pl.cdiv(S, T)
    Sp = n_chunks * T

    pad_cols = lambda w: jnp.pad(w.astype(f32), ((0, 0), (0, Hp - H)))
    pad_hh = lambda w: jnp.pad(w.astype(f32), ((0, Hp - H), (0, Hp - H)))

    # ---- Hoisted input projection (one big matmul), biases folded in. ----
    wx_fused = jnp.concatenate(
        [pad_cols(params["wxu"]), pad_cols(params["wxr"]), pad_cols(params["wxc"])],
        axis=1)                                                     # (D, 3*Hp)
    b_fused = jnp.concatenate(
        [pad_cols(params["bu"]), pad_cols(params["br"]), pad_cols(params["bc"])],
        axis=1)                                                     # (1, 3*Hp)
    pre = jnp.einsum("bsd,dk->sbk", inputs.astype(f32), wx_fused) + b_fused
    pre = jnp.pad(pre, ((0, Sp - S), (0, Bp - B), (0, 0)))          # (Sp, Bp, 3*Hp)

    # ---- Fused / padded recurrent weights. Zero-padding keeps padded h
    # columns exactly zero through the recurrence (u=0.5, c=0 on pad cols). ----
    wh_ur = jnp.concatenate([pad_hh(params["whu"]), pad_hh(params["whr"])], axis=1)
    wh_c = pad_hh(params["whc"])

    kernel = functools.partial(_gru_recurrent_kernel,
                               hp=Hp, t_chunk=T, seq_len=S, seq_pad=Sp)

    grid_spec = pltpu.PrefetchScalarGridSpec(
        num_scalar_prefetch=0,
        grid=(n_btiles, n_chunks),
        in_specs=[
            pl.BlockSpec((T, TB, 3 * Hp), lambda b, tc: (tc, b, 0)),  # pre-acts
            pl.BlockSpec((Hp, 2 * Hp), lambda b, tc: (0, 0)),         # [Whu|Whr]
            pl.BlockSpec((Hp, Hp), lambda b, tc: (0, 0)),             # Whc
        ],
        out_specs=pl.BlockSpec((TB, Hp), lambda b, tc: (b, 0)),
        scratch_shapes=[pltpu.VMEM((TB, Hp), jnp.float32)],           # resident h
    )

    cost = pl.CostEstimate(
        flops=2 * Sp * Bp * 3 * Hp * Hp + 10 * Sp * Bp * Hp,
        transcendentals=3 * Sp * Bp * Hp,
        bytes_accessed=4 * (Sp * Bp * 3 * Hp + 3 * Hp * Hp + Bp * Hp))

    h_pad = pl.pallas_call(
        kernel,
        out_shape=jax.ShapeDtypeStruct((Bp, Hp), jnp.float32),
        grid_spec=grid_spec,
        compiler_params=pltpu.CompilerParams(
            dimension_semantics=("parallel", "arbitrary")),
        cost_estimate=cost,
    )(pre, wh_ur, wh_c)

    return h_pad[:B, :H]


def init_params(key, input_size, hidden_size):
    """Deterministic init mimicking nn.Linear(in+hidden, hidden) x3."""
    fan_in = input_size + hidden_size
    bound = 1.0 / jnp.sqrt(jnp.float32(fan_in))
    keys = jax.random.split(key, 6)

    def linear(kw, kb):
        # PyTorch Linear weight is (out, in); we store it transposed (in, out).
        w = jax.random.uniform(kw, (fan_in, hidden_size), jnp.float32, -bound, bound)
        b = jax.random.uniform(kb, (1, hidden_size), jnp.float32, -bound, bound)
        return w, b

    wu, bu = linear(keys[0], keys[1])
    wr, br = linear(keys[2], keys[3])
    wc, bc = linear(keys[4], keys[5])
    D = input_size
    return {
        "wxu": wu[:D], "whu": wu[D:], "bu": bu,
        "wxr": wr[:D], "whr": wr[D:], "br": br,
        "wxc": wc[:D], "whc": wc[D:], "bc": bc,
    }


def gru_reference(inputs, params):
    """Pure-JAX reference matching the PyTorch module exactly."""
    B, S, D = inputs.shape
    H = params["bu"].shape[-1]
    h = jnp.zeros((B, H), jnp.float32)
    for i in range(S):
        x = inputs[:, i, :]
        u = jax.nn.sigmoid(x @ params["wxu"] + h @ params["whu"] + params["bu"])
        r = jax.nn.sigmoid(x @ params["wxr"] + h @ params["whr"] + params["br"])
        c = jnp.tanh(x @ params["wxc"] + (r * h) @ params["whc"] + params["bc"])
        h = (1.0 - u) * h + u * c
    return h


if __name__ == "__main__":
    B, S, D, H = 2, 8, 16, 32
    key = jax.random.PRNGKey(0)
    k_in, k_par = jax.random.split(key)

    inputs = jax.random.normal(k_in, (B, S, D), jnp.float32)
    params = init_params(k_par, D, H)

    out = gru_forward(inputs, params)
    out = jax.block_until_ready(out)

    ref = gru_reference(inputs, params)
    assert out.shape == (B, H)
    assert jnp.allclose(out, ref, atol=1e-5, rtol=1e-5), "mismatch vs reference"

    print("KERNEL_OK")
</pallas_src>

<mosaic_0001>
module attributes {stable_mosaic.version = 11 : i64} {
  func.func @_gru_recurrent_kernel(%arg0: i32, %arg1: i32, %arg2: memref<8x8x384xf32, #tpu.memory_space<vmem>>, %arg3: memref<128x256xf32, #tpu.memory_space<vmem>>, %arg4: memref<128x128xf32, #tpu.memory_space<vmem>>, %arg5: memref<8x128xf32, #tpu.memory_space<vmem>>, %arg6: memref<8x128xf32, #tpu.memory_space<vmem>>) attributes {dimension_semantics = [#tpu.dimension_semantics<parallel>, #tpu.dimension_semantics<arbitrary>], iteration_bounds = array<i64: 1, 1>, scalar_prefetch = 0 : i64, scratch_operands = 1 : i64, tpu.core_type = #tpu.core_type<tc>, window_params = [{transform_indices = @transform_0, window_bounds = array<i64: 8, 8, 384>}, {pipeline_mode = #tpu.pipeline_mode<synchronous>, transform_indices = @transform_1, window_bounds = array<i64: 128, 256>}, {pipeline_mode = #tpu.pipeline_mode<synchronous>, transform_indices = @transform_2, window_bounds = array<i64: 128, 128>}, {transform_indices = @transform_3, window_bounds = array<i64: 8, 128>}]} {
    %c0_i32 = arith.constant 0 : i32
    %0 = arith.cmpi eq, %arg1, %c0_i32 : i32
    %1 = arith.extui %0 : i1 to i32
    %c0_i32_0 = arith.constant 0 : i32
    %2 = arith.cmpi ne, %1, %c0_i32_0 : i32
    scf.if %2 {
      %cst_66 = arith.constant 0.000000e+00 : f32
      %250 = vector.broadcast %cst_66 : f32 to vector<8x128xf32>
      %c0_67 = arith.constant 0 : index
      %c0_68 = arith.constant 0 : index
      %251 = vector.load %arg6[%c0_67, %c0_68] : memref<8x128xf32, #tpu.memory_space<vmem>>, vector<8x128xf32>
      tpu.vector_store %arg6[%c0_67, %c0_68], %250 {strides = array<i32>} : memref<8x128xf32, #tpu.memory_space<vmem>>, vector<8x128xf32>,
    } else {
    }
    %c0 = arith.constant 0 : index
    %c0_1 = arith.constant 0 : index
    %3 = vector.load %arg3[%c0, %c0_1] : memref<128x256xf32, #tpu.memory_space<vmem>>, vector<128x256xf32>
    %c0_2 = arith.constant 0 : index
    %c0_3 = arith.constant 0 : index
    %4 = vector.load %arg4[%c0_2, %c0_3] : memref<128x128xf32, #tpu.memory_space<vmem>>, vector<128x128xf32>
    %c0_4 = arith.constant 0 : index
    %c0_5 = arith.constant 0 : index
    %5 = vector.load %arg6[%c0_4, %c0_5] : memref<8x128xf32, #tpu.memory_space<vmem>>, vector<8x128xf32>
    %c0_i32_6 = arith.constant 0 : i32
    %6 = arith.index_cast %c0_i32_6 : i32 to index
    %c0_7 = arith.constant 0 : index
    %c0_8 = arith.constant 0 : index
    %7 = vector.load %arg2[%6, %c0_7, %c0_8] : memref<8x8x384xf32, #tpu.memory_space<vmem>>, vector<1x8x384xf32>
    %8 = vector.shape_cast %7 : vector<1x8x384xf32> to vector<8x384xf32>
    %cst = arith.constant dense<0.000000e+00> : vector<8x256xf32>
    %9 = tpu.matmul %5, %3, %cst {dimension_numbers = #tpu.dot_dimension_numbers<[1], [0], [0], [1], [0, 0, 1, 1], [], []>} : vector<8x128xf32>, vector<128x256xf32>, vector<8x256xf32> -> vector<8x256xf32>
    %10 = vector.extract_strided_slice %8 {offsets = [0, 0], sizes = [8, 128], strides = [1, 1]} : vector<8x384xf32> to vector<8x128xf32>
    %11 = vector.extract_strided_slice %9 {offsets = [0, 0], sizes = [8, 128], strides = [1, 1]} : vector<8x256xf32> to vector<8x128xf32>
    %12 = arith.addf %10, %11 : vector<8x128xf32>
    %13 = arith.negf %12 : vector<8x128xf32>
    %14 = math.exp %13 : vector<8x128xf32>
    %cst_9 = arith.constant 1.000000e+00 : f32
    %15 = vector.broadcast %cst_9 : f32 to vector<8x128xf32>
    %16 = arith.addf %15, %14 : vector<8x128xf32>
    %17 = arith.divf %15, %16 : vector<8x128xf32>
    %18 = vector.extract_strided_slice %8 {offsets = [0, 128], sizes = [8, 128], strides = [1, 1]} : vector<8x384xf32> to vector<8x128xf32>
    %19 = vector.extract_strided_slice %9 {offsets = [0, 128], sizes = [8, 128], strides = [1, 1]} : vector<8x256xf32> to vector<8x128xf32>
    %20 = arith.addf %18, %19 : vector<8x128xf32>
    %21 = arith.negf %20 : vector<8x128xf32>
    %22 = math.exp %21 : vector<8x128xf32>
    %cst_10 = arith.constant 1.000000e+00 : f32
    %23 = vector.broadcast %cst_10 : f32 to vector<8x128xf32>
    %24 = arith.addf %23, %22 : vector<8x128xf32>
    %25 = arith.divf %23, %24 : vector<8x128xf32>
    %26 = vector.extract_strided_slice %8 {offsets = [0, 256], sizes = [8, 128], strides = [1, 1]} : vector<8x384xf32> to vector<8x128xf32>
    %27 = arith.mulf %25, %5 : vector<8x128xf32>
    %cst_11 = arith.constant dense<0.000000e+00> : vector<8x128xf32>
    %28 = tpu.matmul %27, %4, %cst_11 {dimension_numbers = #tpu.dot_dimension_numbers<[1], [0], [0], [1], [0, 0, 1, 1], [], []>} : vector<8x128xf32>, vector<128x128xf32>, vector<8x128xf32> -> vector<8x128xf32>
    %29 = arith.addf %26, %28 : vector<8x128xf32>
    %30 = math.tanh %29 : vector<8x128xf32>
    %cst_12 = arith.constant 1.000000e+00 : f32
    %31 = vector.broadcast %cst_12 : f32 to vector<8x128xf32>
    %32 = arith.subf %31, %17 : vector<8x128xf32>
    %33 = arith.mulf %32, %5 : vector<8x128xf32>
    %34 = arith.mulf %17, %30 : vector<8x128xf32>
    %35 = arith.addf %33, %34 : vector<8x128xf32>
    %c1_i32 = arith.constant 1 : i32
    %36 = arith.index_cast %c1_i32 : i32 to index
    %c0_13 = arith.constant 0 : index
    %c0_14 = arith.constant 0 : index
    %37 = vector.load %arg2[%36, %c0_13, %c0_14] : memref<8x8x384xf32, #tpu.memory_space<vmem>>, vector<1x8x384xf32>
    %38 = vector.shape_cast %37 : vector<1x8x384xf32> to vector<8x384xf32>
    %cst_15 = arith.constant dense<0.000000e+00> : vector<8x256xf32>
    %39 = tpu.matmul %35, %3, %cst_15 {dimension_numbers = #tpu.dot_dimension_numbers<[1], [0], [0], [1], [0, 0, 1, 1], [], []>} : vector<8x128xf32>, vector<128x256xf32>, vector<8x256xf32> -> vector<8x256xf32>
    %40 = vector.extract_strided_slice %38 {offsets = [0, 0], sizes = [8, 128], strides = [1, 1]} : vector<8x384xf32> to vector<8x128xf32>
    %41 = vector.extract_strided_slice %39 {offsets = [0, 0], sizes = [8, 128], strides = [1, 1]} : vector<8x256xf32> to vector<8x128xf32>
    %42 = arith.addf %40, %41 : vector<8x128xf32>
    %43 = arith.negf %42 : vector<8x128xf32>
    %44 = math.exp %43 : vector<8x128xf32>
    %cst_16 = arith.constant 1.000000e+00 : f32
    %45 = vector.broadcast %cst_16 : f32 to vector<8x128xf32>
    %46 = arith.addf %45, %44 : vector<8x128xf32>
    %47 = arith.divf %45, %46 : vector<8x128xf32>
    %48 = vector.extract_strided_slice %38 {offsets = [0, 128], sizes = [8, 128], strides = [1, 1]} : vector<8x384xf32> to vector<8x128xf32>
    %49 = vector.extract_strided_slice %39 {offsets = [0, 128], sizes = [8, 128], strides = [1, 1]} : vector<8x256xf32> to vector<8x128xf32>
    %50 = arith.addf %48, %49 : vector<8x128xf32>
    %51 = arith.negf %50 : vector<8x128xf32>
    %52 = math.exp %51 : vector<8x128xf32>
    %cst_17 = arith.constant 1.000000e+00 : f32
    %53 = vector.broadcast %cst_17 : f32 to vector<8x128xf32>
    %54 = arith.addf %53, %52 : vector<8x128xf32>
    %55 = arith.divf %53, %54 : vector<8x128xf32>
    %56 = vector.extract_strided_slice %38 {offsets = [0, 256], sizes = [8, 128], strides = [1, 1]} : vector<8x384xf32> to vector<8x128xf32>
    %57 = arith.mulf %55, %35 : vector<8x128xf32>
    %cst_18 = arith.constant dense<0.000000e+00> : vector<8x128xf32>
    %58 = tpu.matmul %57, %4, %cst_18 {dimension_numbers = #tpu.dot_dimension_numbers<[1], [0], [0], [1], [0, 0, 1, 1], [], []>} : vector<8x128xf32>, vector<128x128xf32>, vector<8x128xf32> -> vector<8x128xf32>
    %59 = arith.addf %56, %58 : vector<8x128xf32>
    %60 = math.tanh %59 : vector<8x128xf32>
    %cst_19 = arith.constant 1.000000e+00 : f32
    %61 = vector.broadcast %cst_19 : f32 to vector<8x128xf32>
    %62 = arith.subf %61, %47 : vector<8x128xf32>
    %63 = arith.mulf %62, %35 : vector<8x128xf32>
    %64 = arith.mulf %47, %60 : vector<8x128xf32>
    %65 = arith.addf %63, %64 : vector<8x128xf32>
    %c2_i32 = arith.constant 2 : i32
    %66 = arith.index_cast %c2_i32 : i32 to index
    %c0_20 = arith.constant 0 : index
    %c0_21 = arith.constant 0 : index
    %67 = vector.load %arg2[%66, %c0_20, %c0_21] : memref<8x8x384xf32, #tpu.memory_space<vmem>>, vector<1x8x384xf32>
    %68 = vector.shape_cast %67 : vector<1x8x384xf32> to vector<8x384xf32>
    %cst_22 = arith.constant dense<0.000000e+00> : vector<8x256xf32>
    %69 = tpu.matmul %65, %3, %cst_22 {dimension_numbers = #tpu.dot_dimension_numbers<[1], [0], [0], [1], [0, 0, 1, 1], [], []>} : vector<8x128xf32>, vector<128x256xf32>, vector<8x256xf32> -> vector<8x256xf32>
    %70 = vector.extract_strided_slice %68 {offsets = [0, 0], sizes = [8, 128], strides = [1, 1]} : vector<8x384xf32> to vector<8x128xf32>
    %71 = vector.extract_strided_slice %69 {offsets = [0, 0], sizes = [8, 128], strides = [1, 1]} : vector<8x256xf32> to vector<8x128xf32>
    %72 = arith.addf %70, %71 : vector<8x128xf32>
    %73 = arith.negf %72 : vector<8x128xf32>
    %74 = math.exp %73 : vector<8x128xf32>
    %cst_23 = arith.constant 1.000000e+00 : f32
    %75 = vector.broadcast %cst_23 : f32 to vector<8x128xf32>
    %76 = arith.addf %75, %74 : vector<8x128xf32>
    %77 = arith.divf %75, %76 : vector<8x128xf32>
    %78 = vector.extract_strided_slice %68 {offsets = [0, 128], sizes = [8, 128], strides = [1, 1]} : vector<8x384xf32> to vector<8x128xf32>
    %79 = vector.extract_strided_slice %69 {offsets = [0, 128], sizes = [8, 128], strides = [1, 1]} : vector<8x256xf32> to vector<8x128xf32>
    %80 = arith.addf %78, %79 : vector<8x128xf32>
    %81 = arith.negf %80 : vector<8x128xf32>
    %82 = math.exp %81 : vector<8x128xf32>
    %cst_24 = arith.constant 1.000000e+00 : f32
    %83 = vector.broadcast %cst_24 : f32 to vector<8x128xf32>
    %84 = arith.addf %83, %82 : vector<8x128xf32>
    %85 = arith.divf %83, %84 : vector<8x128xf32>
    %86 = vector.extract_strided_slice %68 {offsets = [0, 256], sizes = [8, 128], strides = [1, 1]} : vector<8x384xf32> to vector<8x128xf32>
    %87 = arith.mulf %85, %65 : vector<8x128xf32>
    %cst_25 = arith.constant dense<0.000000e+00> : vector<8x128xf32>
    %88 = tpu.matmul %87, %4, %cst_25 {dimension_numbers = #tpu.dot_dimension_numbers<[1], [0], [0], [1], [0, 0, 1, 1], [], []>} : vector<8x128xf32>, vector<128x128xf32>, vector<8x128xf32> -> vector<8x128xf32>
    %89 = arith.addf %86, %88 : vector<8x128xf32>
    %90 = math.tanh %89 : vector<8x128xf32>
    %cst_26 = arith.constant 1.000000e+00 : f32
    %91 = vector.broadcast %cst_26 : f32 to vector<8x128xf32>
    %92 = arith.subf %91, %77 : vector<8x128xf32>
    %93 = arith.mulf %92, %65 : vector<8x128xf32>
    %94 = arith.mulf %77, %90 : vector<8x128xf32>
    %95 = arith.addf %93, %94 : vector<8x128xf32>
    %c3_i32 = arith.constant 3 : i32
    %96 = arith.index_cast %c3_i32 : i32 to index
    %c0_27 = arith.constant 0 : index
    %c0_28 = arith.constant 0 : index
    %97 = vector.load %arg2[%96, %c0_27, %c0_28] : memref<8x8x384xf32, #tpu.memory_space<vmem>>, vector<1x8x384xf32>
    %98 = vector.shape_cast %97 : vector<1x8x384xf32> to vector<8x384xf32>
    %cst_29 = arith.constant dense<0.000000e+00> : vector<8x256xf32>
    %99 = tpu.matmul %95, %3, %cst_29 {dimension_numbers = #tpu.dot_dimension_numbers<[1], [0], [0], [1], [0, 0, 1, 1], [], []>} : vector<8x128xf32>, vector<128x256xf32>, vector<8x256xf32> -> vector<8x256xf32>
    %100 = vector.extract_strided_slice %98 {offsets = [0, 0], sizes = [8, 128], strides = [1, 1]} : vector<8x384xf32> to vector<8x128xf32>
    %101 = vector.extract_strided_slice %99 {offsets = [0, 0], sizes = [8, 128], strides = [1, 1]} : vector<8x256xf32> to vector<8x128xf32>
    %102 = arith.addf %100, %101 : vector<8x128xf32>
    %103 = arith.negf %102 : vector<8x128xf32>
    %104 = math.exp %103 : vector<8x128xf32>
    %cst_30 = arith.constant 1.000000e+00 : f32
    %105 = vector.broadcast %cst_30 : f32 to vector<8x128xf32>
    %106 = arith.addf %105, %104 : vector<8x128xf32>
    %107 = arith.divf %105, %106 : vector<8x128xf32>
    %108 = vector.extract_strided_slice %98 {offsets = [0, 128], sizes = [8, 128], strides = [1, 1]} : vector<8x384xf32> to vector<8x128xf32>
    %109 = vector.extract_strided_slice %99 {offsets = [0, 128], sizes = [8, 128], strides = [1, 1]} : vector<8x256xf32> to vector<8x128xf32>
    %110 = arith.addf %108, %109 : vector<8x128xf32>
    %111 = arith.negf %110 : vector<8x128xf32>
    %112 = math.exp %111 : vector<8x128xf32>
    %cst_31 = arith.constant 1.000000e+00 : f32
    %113 = vector.broadcast %cst_31 : f32 to vector<8x128xf32>
    %114 = arith.addf %113, %112 : vector<8x128xf32>
    %115 = arith.divf %113, %114 : vector<8x128xf32>
    %116 = vector.extract_strided_slice %98 {offsets = [0, 256], sizes = [8, 128], strides = [1, 1]} : vector<8x384xf32> to vector<8x128xf32>
    %117 = arith.mulf %115, %95 : vector<8x128xf32>
    %cst_32 = arith.constant dense<0.000000e+00> : vector<8x128xf32>
    %118 = tpu.matmul %117, %4, %cst_32 {dimension_numbers = #tpu.dot_dimension_numbers<[1], [0], [0], [1], [0, 0, 1, 1], [], []>} : vector<8x128xf32>, vector<128x128xf32>, vector<8x128xf32> -> vector<8x128xf32>
    %119 = arith.addf %116, %118 : vector<8x128xf32>
    %120 = math.tanh %119 : vector<8x128xf32>
    %cst_33 = arith.constant 1.000000e+00 : f32
    %121 = vector.broadcast %cst_33 : f32 to vector<8x128xf32>
    %122 = arith.subf %121, %107 : vector<8x128xf32>
    %123 = arith.mulf %122, %95 : vector<8x128xf32>
    %124 = arith.mulf %107, %120 : vector<8x128xf32>
    %125 = arith.addf %123, %124 : vector<8x128xf32>
    %c4_i32 = arith.constant 4 : i32
    %126 = arith.index_cast %c4_i32 : i32 to index
    %c0_34 = arith.constant 0 : index
    %c0_35 = arith.constant 0 : index
    %127 = vector.load %arg2[%126, %c0_34, %c0_35] : memref<8x8x384xf32, #tpu.memory_space<vmem>>, vector<1x8x384xf32>
    %128 = vector.shape_cast %127 : vector<1x8x384xf32> to vector<8x384xf32>
    %cst_36 = arith.constant dense<0.000000e+00> : vector<8x256xf32>
    %129 = tpu.matmul %125, %3, %cst_36 {dimension_numbers = #tpu.dot_dimension_numbers<[1], [0], [0], [1], [0, 0, 1, 1], [], []>} : vector<8x128xf32>, vector<128x256xf32>, vector<8x256xf32> -> vector<8x256xf32>
    %130 = vector.extract_strided_slice %128 {offsets = [0, 0], sizes = [8, 128], strides = [1, 1]} : vector<8x384xf32> to vector<8x128xf32>
    %131 = vector.extract_strided_slice %129 {offsets = [0, 0], sizes = [8, 128], strides = [1, 1]} : vector<8x256xf32> to vector<8x128xf32>
    %132 = arith.addf %130, %131 : vector<8x128xf32>
    %133 = arith.negf %132 : vector<8x128xf32>
    %134 = math.exp %133 : vector<8x128xf32>
    %cst_37 = arith.constant 1.000000e+00 : f32
    %135 = vector.broadcast %cst_37 : f32 to vector<8x128xf32>
    %136 = arith.addf %135, %134 : vector<8x128xf32>
    %137 = arith.divf %135, %136 : vector<8x128xf32>
    %138 = vector.extract_strided_slice %128 {offsets = [0, 128], sizes = [8, 128], strides = [1, 1]} : vector<8x384xf32> to vector<8x128xf32>
    %139 = vector.extract_strided_slice %129 {offsets = [0, 128], sizes = [8, 128], strides = [1, 1]} : vector<8x256xf32> to vector<8x128xf32>
    %140 = arith.addf %138, %139 : vector<8x128xf32>
    %141 = arith.negf %140 : vector<8x128xf32>
    %142 = math.exp %141 : vector<8x128xf32>
    %cst_38 = arith.constant 1.000000e+00 : f32
    %143 = vector.broadcast %cst_38 : f32 to vector<8x128xf32>
    %144 = arith.addf %143, %142 : vector<8x128xf32>
    %145 = arith.divf %143, %144 : vector<8x128xf32>
    %146 = vector.extract_strided_slice %128 {offsets = [0, 256], sizes = [8, 128], strides = [1, 1]} : vector<8x384xf32> to vector<8x128xf32>
    %147 = arith.mulf %145, %125 : vector<8x128xf32>
    %cst_39 = arith.constant dense<0.000000e+00> : vector<8x128xf32>
    %148 = tpu.matmul %147, %4, %cst_39 {dimension_numbers = #tpu.dot_dimension_numbers<[1], [0], [0], [1], [0, 0, 1, 1], [], []>} : vector<8x128xf32>, vector<128x128xf32>, vector<8x128xf32> -> vector<8x128xf32>
    %149 = arith.addf %146, %148 : vector<8x128xf32>
    %150 = math.tanh %149 : vector<8x128xf32>
    %cst_40 = arith.constant 1.000000e+00 : f32
    %151 = vector.broadcast %cst_40 : f32 to vector<8x128xf32>
    %152 = arith.subf %151, %137 : vector<8x128xf32>
    %153 = arith.mulf %152, %125 : vector<8x128xf32>
    %154 = arith.mulf %137, %150 : vector<8x128xf32>
    %155 = arith.addf %153, %154 : vector<8x128xf32>
    %c5_i32 = arith.constant 5 : i32
    %156 = arith.index_cast %c5_i32 : i32 to index
    %c0_41 = arith.constant 0 : index
    %c0_42 = arith.constant 0 : index
    %157 = vector.load %arg2[%156, %c0_41, %c0_42] : memref<8x8x384xf32, #tpu.memory_space<vmem>>, vector<1x8x384xf32>
    %158 = vector.shape_cast %157 : vector<1x8x384xf32> to vector<8x384xf32>
    %cst_43 = arith.constant dense<0.000000e+00> : vector<8x256xf32>
    %159 = tpu.matmul %155, %3, %cst_43 {dimension_numbers = #tpu.dot_dimension_numbers<[1], [0], [0], [1], [0, 0, 1, 1], [], []>} : vector<8x128xf32>, vector<128x256xf32>, vector<8x256xf32> -> vector<8x256xf32>
    %160 = vector.extract_strided_slice %158 {offsets = [0, 0], sizes = [8, 128], strides = [1, 1]} : vector<8x384xf32> to vector<8x128xf32>
    %161 = vector.extract_strided_slice %159 {offsets = [0, 0], sizes = [8, 128], strides = [1, 1]} : vector<8x256xf32> to vector<8x128xf32>
    %162 = arith.addf %160, %161 : vector<8x128xf32>
    %163 = arith.negf %162 : vector<8x128xf32>
    %164 = math.exp %163 : vector<8x128xf32>
    %cst_44 = arith.constant 1.000000e+00 : f32
    %165 = vector.broadcast %cst_44 : f32 to vector<8x128xf32>
    %166 = arith.addf %165, %164 : vector<8x128xf32>
    %167 = arith.divf %165, %166 : vector<8x128xf32>
    %168 = vector.extract_strided_slice %158 {offsets = [0, 128], sizes = [8, 128], strides = [1, 1]} : vector<8x384xf32> to vector<8x128xf32>
    %169 = vector.extract_strided_slice %159 {offsets = [0, 128], sizes = [8, 128], strides = [1, 1]} : vector<8x256xf32> to vector<8x128xf32>
    %170 = arith.addf %168, %169 : vector<8x128xf32>
    %171 = arith.negf %170 : vector<8x128xf32>
    %172 = math.exp %171 : vector<8x128xf32>
    %cst_45 = arith.constant 1.000000e+00 : f32
    %173 = vector.broadcast %cst_45 : f32 to vector<8x128xf32>
    %174 = arith.addf %173, %172 : vector<8x128xf32>
    %175 = arith.divf %173, %174 : vector<8x128xf32>
    %176 = vector.extract_strided_slice %158 {offsets = [0, 256], sizes = [8, 128], strides = [1, 1]} : vector<8x384xf32> to vector<8x128xf32>
    %177 = arith.mulf %175, %155 : vector<8x128xf32>
    %cst_46 = arith.constant dense<0.000000e+00> : vector<8x128xf32>
    %178 = tpu.matmul %177, %4, %cst_46 {dimension_numbers = #tpu.dot_dimension_numbers<[1], [0], [0], [1], [0, 0, 1, 1], [], []>} : vector<8x128xf32>, vector<128x128xf32>, vector<8x128xf32> -> vector<8x128xf32>
    %179 = arith.addf %176, %178 : vector<8x128xf32>
    %180 = math.tanh %179 : vector<8x128xf32>
    %cst_47 = arith.constant 1.000000e+00 : f32
    %181 = vector.broadcast %cst_47 : f32 to vector<8x128xf32>
    %182 = arith.subf %181, %167 : vector<8x128xf32>
    %183 = arith.mulf %182, %155 : vector<8x128xf32>
    %184 = arith.mulf %167, %180 : vector<8x128xf32>
    %185 = arith.addf %183, %184 : vector<8x128xf32>
    %c6_i32 = arith.constant 6 : i32
    %186 = arith.index_cast %c6_i32 : i32 to index
    %c0_48 = arith.constant 0 : index
    %c0_49 = arith.constant 0 : index
    %187 = vector.load %arg2[%186, %c0_48, %c0_49] : memref<8x8x384xf32, #tpu.memory_space<vmem>>, vector<1x8x384xf32>
    %188 = vector.shape_cast %187 : vector<1x8x384xf32> to vector<8x384xf32>
    %cst_50 = arith.constant dense<0.000000e+00> : vector<8x256xf32>
    %189 = tpu.matmul %185, %3, %cst_50 {dimension_numbers = #tpu.dot_dimension_numbers<[1], [0], [0], [1], [0, 0, 1, 1], [], []>} : vector<8x128xf32>, vector<128x256xf32>, vector<8x256xf32> -> vector<8x256xf32>
    %190 = vector.extract_strided_slice %188 {offsets = [0, 0], sizes = [8, 128], strides = [1, 1]} : vector<8x384xf32> to vector<8x128xf32>
    %191 = vector.extract_strided_slice %189 {offsets = [0, 0], sizes = [8, 128], strides = [1, 1]} : vector<8x256xf32> to vector<8x128xf32>
    %192 = arith.addf %190, %191 : vector<8x128xf32>
    %193 = arith.negf %192 : vector<8x128xf32>
    %194 = math.exp %193 : vector<8x128xf32>
    %cst_51 = arith.constant 1.000000e+00 : f32
    %195 = vector.broadcast %cst_51 : f32 to vector<8x128xf32>
    %196 = arith.addf %195, %194 : vector<8x128xf32>
    %197 = arith.divf %195, %196 : vector<8x128xf32>
    %198 = vector.extract_strided_slice %188 {offsets = [0, 128], sizes = [8, 128], strides = [1, 1]} : vector<8x384xf32> to vector<8x128xf32>
    %199 = vector.extract_strided_slice %189 {offsets = [0, 128], sizes = [8, 128], strides = [1, 1]} : vector<8x256xf32> to vector<8x128xf32>
    %200 = arith.addf %198, %199 : vector<8x128xf32>
    %201 = arith.negf %200 : vector<8x128xf32>
    %202 = math.exp %201 : vector<8x128xf32>
    %cst_52 = arith.constant 1.000000e+00 : f32
    %203 = vector.broadcast %cst_52 : f32 to vector<8x128xf32>
    %204 = arith.addf %203, %202 : vector<8x128xf32>
    %205 = arith.divf %203, %204 : vector<8x128xf32>
    %206 = vector.extract_strided_slice %188 {offsets = [0, 256], sizes = [8, 128], strides = [1, 1]} : vector<8x384xf32> to vector<8x128xf32>
    %207 = arith.mulf %205, %185 : vector<8x128xf32>
    %cst_53 = arith.constant dense<0.000000e+00> : vector<8x128xf32>
    %208 = tpu.matmul %207, %4, %cst_53 {dimension_numbers = #tpu.dot_dimension_numbers<[1], [0], [0], [1], [0, 0, 1, 1], [], []>} : vector<8x128xf32>, vector<128x128xf32>, vector<8x128xf32> -> vector<8x128xf32>
    %209 = arith.addf %206, %208 : vector<8x128xf32>
    %210 = math.tanh %209 : vector<8x128xf32>
    %cst_54 = arith.constant 1.000000e+00 : f32
    %211 = vector.broadcast %cst_54 : f32 to vector<8x128xf32>
    %212 = arith.subf %211, %197 : vector<8x128xf32>
    %213 = arith.mulf %212, %185 : vector<8x128xf32>
    %214 = arith.mulf %197, %210 : vector<8x128xf32>
    %215 = arith.addf %213, %214 : vector<8x128xf32>
    %c7_i32 = arith.constant 7 : i32
    %216 = arith.index_cast %c7_i32 : i32 to index
    %c0_55 = arith.constant 0 : index
    %c0_56 = arith.constant 0 : index
    %217 = vector.load %arg2[%216, %c0_55, %c0_56] : memref<8x8x384xf32, #tpu.memory_space<vmem>>, vector<1x8x384xf32>
    %218 = vector.shape_cast %217 : vector<1x8x384xf32> to vector<8x384xf32>
    %cst_57 = arith.constant dense<0.000000e+00> : vector<8x256xf32>
    %219 = tpu.matmul %215, %3, %cst_57 {dimension_numbers = #tpu.dot_dimension_numbers<[1], [0], [0], [1], [0, 0, 1, 1], [], []>} : vector<8x128xf32>, vector<128x256xf32>, vector<8x256xf32> -> vector<8x256xf32>
    %220 = vector.extract_strided_slice %218 {offsets = [0, 0], sizes = [8, 128], strides = [1, 1]} : vector<8x384xf32> to vector<8x128xf32>
    %221 = vector.extract_strided_slice %219 {offsets = [0, 0], sizes = [8, 128], strides = [1, 1]} : vector<8x256xf32> to vector<8x128xf32>
    %222 = arith.addf %220, %221 : vector<8x128xf32>
    %223 = arith.negf %222 : vector<8x128xf32>
    %224 = math.exp %223 : vector<8x128xf32>
    %cst_58 = arith.constant 1.000000e+00 : f32
    %225 = vector.broadcast %cst_58 : f32 to vector<8x128xf32>
    %226 = arith.addf %225, %224 : vector<8x128xf32>
    %227 = arith.divf %225, %226 : vector<8x128xf32>
    %228 = vector.extract_strided_slice %218 {offsets = [0, 128], sizes = [8, 128], strides = [1, 1]} : vector<8x384xf32> to vector<8x128xf32>
    %229 = vector.extract_strided_slice %219 {offsets = [0, 128], sizes = [8, 128], strides = [1, 1]} : vector<8x256xf32> to vector<8x128xf32>
    %230 = arith.addf %228, %229 : vector<8x128xf32>
    %231 = arith.negf %230 : vector<8x128xf32>
    %232 = math.exp %231 : vector<8x128xf32>
    %cst_59 = arith.constant 1.000000e+00 : f32
    %233 = vector.broadcast %cst_59 : f32 to vector<8x128xf32>
    %234 = arith.addf %233, %232 : vector<8x128xf32>
    %235 = arith.divf %233, %234 : vector<8x128xf32>
    %236 = vector.extract_strided_slice %218 {offsets = [0, 256], sizes = [8, 128], strides = [1, 1]} : vector<8x384xf32> to vector<8x128xf32>
    %237 = arith.mulf %235, %215 : vector<8x128xf32>
    %cst_60 = arith.constant dense<0.000000e+00> : vector<8x128xf32>
    %238 = tpu.matmul %237, %4, %cst_60 {dimension_numbers = #tpu.dot_dimension_numbers<[1], [0], [0], [1], [0, 0, 1, 1], [], []>} : vector<8x128xf32>, vector<128x128xf32>, vector<8x128xf32> -> vector<8x128xf32>
    %239 = arith.addf %236, %238 : vector<8x128xf32>
    %240 = math.tanh %239 : vector<8x128xf32>
    %cst_61 = arith.constant 1.000000e+00 : f32
    %241 = vector.broadcast %cst_61 : f32 to vector<8x128xf32>
    %242 = arith.subf %241, %227 : vector<8x128xf32>
    %243 = arith.mulf %242, %215 : vector<8x128xf32>
    %244 = arith.mulf %227, %240 : vector<8x128xf32>
    %245 = arith.addf %243, %244 : vector<8x128xf32>
    %c8_i32 = arith.constant 8 : i32
    %c0_62 = arith.constant 0 : index
    %c0_63 = arith.constant 0 : index
    %246 = vector.load %arg6[%c0_62, %c0_63] : memref<8x128xf32, #tpu.memory_space<vmem>>, vector<8x128xf32>
    tpu.vector_store %arg6[%c0_62, %c0_63], %245 {strides = array<i32>} : memref<8x128xf32, #tpu.memory_space<vmem>>, vector<8x128xf32>,
    %c0_i32_64 = arith.constant 0 : i32
    %247 = arith.cmpi eq, %arg1, %c0_i32_64 : i32
    %248 = arith.extui %247 : i1 to i32
    %c0_i32_65 = arith.constant 0 : i32
    %249 = arith.cmpi ne, %248, %c0_i32_65 : i32
    scf.if %249 {
      %c0_66 = arith.constant 0 : index
      %c0_67 = arith.constant 0 : index
      %250 = vector.load %arg5[%c0_66, %c0_67] : memref<8x128xf32, #tpu.memory_space<vmem>>, vector<8x128xf32>
      tpu.vector_store %arg5[%c0_66, %c0_67], %245 {strides = array<i32>} : memref<8x128xf32, #tpu.memory_space<vmem>>, vector<8x128xf32>,
    } else {
    }
    return
  }
  func.func @transform_0(%arg0: i32, %arg1: i32) -> (i32, i32, i32) {
    %c0_i32 = arith.constant 0 : i32
    %c0_i32_0 = arith.constant 0 : i32
    return %arg1, %arg0, %c0_i32 : i32, i32, i32
  }
  func.func @transform_1(%arg0: i32, %arg1: i32) -> (i32, i32) {
    %c0_i32 = arith.constant 0 : i32
    %c0_i32_0 = arith.constant 0 : i32
    %c0_i32_1 = arith.constant 0 : i32
    return %c0_i32, %c0_i32_0 : i32, i32
  }
  func.func @transform_2(%arg0: i32, %arg1: i32) -> (i32, i32) {
    %c0_i32 = arith.constant 0 : i32
    %c0_i32_0 = arith.constant 0 : i32
    %c0_i32_1 = arith.constant 0 : i32
    return %c0_i32, %c0_i32_0 : i32, i32
  }
  func.func @transform_3(%arg0: i32, %arg1: i32) -> (i32, i32) {
    %c0_i32 = arith.constant 0 : i32
    %c0_i32_0 = arith.constant 0 : i32
    return %arg0, %c0_i32 : i32, i32
  }
}

</mosaic_0001>

<bundles_post_ra>
// kernel: tpu_custom_call.1
= control target key start
LH: loop header
LB: loop body
LE: loop exit
PB: predicated region body
PF: predicated region fallthrough
CT: control target
= control target key end

     0   :  { %8 = vsyncpa [#allocation4], 0  ;;  %s2919_s0 = inlined_call_operand.hbm [shape: f32[8,8,384], index: 0, kind: input, shape index: {}]   ;;  %s2920_s1 = inlined_call_operand.hbm [shape: f32[128,256], index: 1, kind: input, shape index: {}]   ;;  %s2921_s2 = inlined_call_operand.hbm [shape: f32[128,128], index: 2, kind: input, shape index: {}]   ;;  %s2922_s3 = inlined_call_operand.hbm [shape: f32[8,128], index: 3, kind: output, shape index: {}]  }
   0x1   :  { %9 = vsyncpa [#allocation7], 0 }
   0x2   :  { %10 = vsyncpa [#allocation5], 0  ;;  %s2116_s12 = smov [#allocation6]  }
   0x3   :  { %s28_s13 = sshll.u32 %s2116_s12, 4  ;;  %s29_s13 = int_to_ptr.vmem [resolvable:$true] %s28_s13 }
   0x4   :  { %s2038_s14 = scalar_lea.vmem %s29_s13, 4096  ;;  %p2043_p1 = scmp.lt.s32.totalorder %s29_s13, %s29_s13 }
   0x5   :  { %p2039_p0 = scmp.ne.s32.totalorder %s29_s13, %s2038_s14  ;;  %p2044_p2 = scmp.lt.s32.totalorder %s2038_s14, %s2038_s14 }
   0x7   :  { %p2045_p3 = por %p2044_p2, %p2043_p1 }
   0x9   :  { %p2046_p4 = pnand %p2045_p3, %p2039_p0 }
   0xb   :  { %2049 = shalt.err (!%p2046_p4)
}
   0xc   :  { %s2117_s15 = smov 256   ;;  %s2118_s16 = smov 16  }
   0xd   :  { %34 = dma.hbm_to_vmem [thread:$0]  %s2920_s1, 4096, %s29_s13, [#allocation7], %s2117_s15, %s2117_s15, %s2118_s16  }
   0xe   :  { %s2119_s19 = smov [#allocation3]  }
   0xf   :  { %s16_s20 = sshll.u32 %s2119_s19, 4  ;;  %s17_s20 = int_to_ptr.vmem [resolvable:$true] %s16_s20 }
  0x10   :  { %s2058_s21 = scalar_lea.vmem %s17_s20, 3072  ;;  %p2063_p6 = scmp.lt.s32.totalorder %s17_s20, %s17_s20 }
  0x11   :  { %p2059_p5 = scmp.ne.s32.totalorder %s17_s20, %s2058_s21  ;;  %p2064_p7 = scmp.lt.s32.totalorder %s2058_s21, %s2058_s21 }
  0x13   :  { %p2065_p8 = por %p2064_p7, %p2063_p6 }
  0x15   :  { %p2066_p9 = pnand %p2065_p8, %p2059_p5 }
  0x17   :  { %2069 = shalt.err (!%p2066_p9)
}
  0x18   :  { %s2120_s22 = smov 384   ;;  %s2121_s23 = smov 24  }
  0x19   :  { %22 = dma.hbm_to_vmem [thread:$0]  %s2919_s0, 3072, %s17_s20, [#allocation4], %s2120_s22, %s2120_s22, %s2121_s23  }
  0x1a   :  { %s2122_s26 = smov [#allocation8]  }
  0x1b   :  { %s40_s27 = sshll.u32 %s2122_s26, 4  ;;  %s41_s27 = int_to_ptr.vmem [resolvable:$true] %s40_s27 }
  0x1c   :  { %s2078_s1 = scalar_lea.vmem %s41_s27, 2048  ;;  %p2083_p11 = scmp.lt.s32.totalorder %s41_s27, %s41_s27 }
  0x1d   :  { %p2079_p10 = scmp.ne.s32.totalorder %s41_s27, %s2078_s1  ;;  %p2084_p12 = scmp.lt.s32.totalorder %s2078_s1, %s2078_s1 }
  0x1f   :  { %p2085_p13 = por %p2084_p12, %p2083_p11 }
  0x21   :  { %p2086_p0 = pnand %p2085_p13, %p2079_p10 }
  0x23   :  { %2089 = shalt.err (!%p2086_p0)
}
  0x24   :  { %s2123_s28 = smov 128   ;;  %s2124_s29 = smov 8  }
  0x25   :  { %46 = dma.hbm_to_vmem [thread:$0]  %s2921_s2, 2048, %s41_s27, [#allocation7], %s2123_s28, %s2123_s28, %s2124_s29  }
  0x26   :  { %2110 = dma.done.wait [#allocation4], 3072  }
  0x27   :  { %2111 = vsyncadd [#allocation4], 4294964224 }
  0x28   :  { %2112 = dma.done.wait [#allocation7], 6144  }
  0x29   :  { %2113 = vsyncadd [#allocation7], 4294961152  ;;  %v2125_v0 = vmov 0.0   ;;  %v2159_v1 = vld [vmem:[#allocation6 + $0xf8] sm:$0xff]  ;;  %v2161_v2 = vld [vmem:[#allocation6 + $0xf0] sm:$0xff]  ;;  %vm2126_vm0 = vmmov 0  }
  0x2a   :  { %177 = vmatprep.mubr.f32.mxu0 %v2125_v0  ;;  %1610 = vmatprep.subr.mxu1 %v2125_v0  ;;  %v2163_v3 = vld [vmem:[#allocation6 + $0xe8] sm:$0xff]  ;;  %v2166_v4 = vld [vmem:[#allocation6 + $0xe0] sm:$0xff]  ;;  %v2169_v5 = vld [vmem:[#allocation6 + $0xd8] sm:$0xff]  ;;  %s2127_s0 = smov [#allocation9]  }
  0x2b   :  { %113 = vmatprep.subr.mxu0 %v2159_v1  ;;  %v2172_v6 = vld [vmem:[#allocation6 + $0xd0] sm:$0xff]  ;;  %v2175_v7 = vld [vmem:[#allocation6 + $0xc8] sm:$0xff]  ;;  %v2178_v8 = vld [vmem:[#allocation6 + $0xc0] sm:$0xff]  ;;  %1642 = vmatprep.mubr.msk.f32.mxu1 %vm2126_vm0, %v2125_v0  ;;  %s1448_s2 = sshll.u32 %s2127_s0, 4  ;;  %s1449_s2 = int_to_ptr.vmem [resolvable:$true] %s1448_s2 }
  0x2c   :  { %114 = vmatpush1.msra.mxu0 %v2161_v2  ;;  %v2181_v9 = vld [vmem:[#allocation6 + $0xb8] sm:$0xff]  ;;  %v2184_v10 = vld [vmem:[#allocation6 + $0xb0] sm:$0xff]  ;;  %v2187_v11 = vld [vmem:[#allocation6 + $0xa8] sm:$0xff]  ;;  %s2090_s5 = scalar_lea.vmem %s1449_s2, 128  ;;  %p2095_p2 = scmp.lt.s32.totalorder %s1449_s2, %s1449_s2 }
  0x2d   :  { %115 = vmatprep.subr.mxu0 %v2163_v3  ;;  %v2190_v12 = vld [vmem:[#allocation6 + $0xa0] sm:$0xff]  ;;  %v2193_v13 = vld [vmem:[#allocation6 + $0x98] sm:$0xff]  ;;  %v2196_v14 = vld [vmem:[#allocation6 + $0x90] sm:$0xff]  ;;  %p2091_p1 = scmp.ne.s32.totalorder %s1449_s2, %s2090_s5  ;;  %p2096_p3 = scmp.lt.s32.totalorder %s2090_s5, %s2090_s5 }
  0x2e   :  { %116 = vmatpush1.msra.mxu0 %v2166_v4  ;;  %v2199_v15 = vld [vmem:[#allocation6 + $0x88] sm:$0xff]  ;;  %v2202_v16 = vld [vmem:[#allocation6 + $0x80] sm:$0xff]  ;;  %v2205_v17 = vld [vmem:[#allocation6 + $0x78] sm:$0xff] }
  0x2f   :  { %117 = vmatprep.subr.mxu0 %v2169_v5  ;;  %v2208_v18 = vld [vmem:[#allocation6 + $0x70] sm:$0xff]  ;;  %v2211_v19 = vld [vmem:[#allocation6 + $0x68] sm:$0xff]  ;;  %v2214_v20 = vld [vmem:[#allocation6 + $0x60] sm:$0xff]  ;;  %p2097_p4 = por %p2096_p3, %p2095_p2 }
  0x30   :  { %118 = vmatpush1.msra.mxu0 %v2172_v6  ;;  %v2217_v21 = vld [vmem:[#allocation6 + $0x58] sm:$0xff]  ;;  %v2220_v22 = vld [vmem:[#allocation6 + $0x50] sm:$0xff]  ;;  %v2223_v23 = vld [vmem:[#allocation6 + $0x48] sm:$0xff] }
  0x31   :  { %119 = vmatprep.subr.mxu0 %v2175_v7  ;;  %v2226_v24 = vld [vmem:[#allocation6 + $0x40] sm:$0xff]  ;;  %v2229_v25 = vld [vmem:[#allocation6 + $0x38] sm:$0xff]  ;;  %v2232_v26 = vld [vmem:[#allocation6 + $0x30] sm:$0xff]  ;;  %p2098_p5 = pnand %p2097_p4, %p2091_p1 }
  0x32   :  { %120 = vmatpush1.msra.mxu0 %v2178_v8  ;;  %v2235_v27 = vld [vmem:[#allocation6 + $0x28] sm:$0xff]  ;;  %v2238_v28 = vld [vmem:[#allocation6 + $0x20] sm:$0xff]  ;;  %v2241_v29 = vld [vmem:[#allocation6 + $0x18] sm:$0xff] }
  0x33   :  { %121 = vmatprep.subr.mxu0 %v2181_v9  ;;  %v2244_v30 = vld [vmem:[#allocation6 + $0x10] sm:$0xff]  ;;  %v2247_v31 = vld [vmem:[#allocation6 + $0x8] sm:$0xff]  ;;  %v2250_v32 = vld [vmem:[#allocation6] sm:$0xff] }
  0x34   :  { %122 = vmatpush1.msra.mxu0 %v2184_v10  ;;  %v2290_v33 = vld [vmem:[#allocation8 + $0x78] sm:$0xff]  ;;  %v2294_v34 = vld [vmem:[#allocation8 + $0x70] sm:$0xff]  ;;  %v2298_v35 = vld [vmem:[#allocation8 + $0x68] sm:$0xff] }
  0x35   :  { %123 = vmatprep.subr.mxu0 %v2187_v11  ;;  %1611 = vmatpush3.msra.mxu1 %v2290_v33  ;;  %v2302_v36 = vld [vmem:[#allocation8 + $0x60] sm:$0xff]  ;;  %v2306_v37 = vld [vmem:[#allocation8 + $0x58] sm:$0xff]  ;;  %v2310_v38 = vld [vmem:[#allocation8 + $0x50] sm:$0xff] }
  0x36   :  { %124 = vmatpush1.msra.mxu0 %v2190_v12  ;;  %1612 = vmatprep.subr.mxu1 %v2125_v0  ;;  %v2314_v39 = vld [vmem:[#allocation8 + $0x48] sm:$0xff]  ;;  %v2318_v40 = vld [vmem:[#allocation8 + $0x40] sm:$0xff]  ;;  %v2322_v41 = vld [vmem:[#allocation8 + $0x38] sm:$0xff] }
  0x37   :  { %125 = vmatprep.subr.mxu0 %v2193_v13  ;;  %1613 = vmatpush3.msra.mxu1 %v2294_v34  ;;  %v2324_v42 = vld [vmem:[#allocation8 + $0x30] sm:$0xff]  ;;  %v2330_v43 = vld [vmem:[#allocation8 + $0x28] sm:$0xff]  ;;  %v2334_v44 = vld [vmem:[#allocation8 + $0x20] sm:$0xff] }
  0x38   :  { %126 = vmatpush1.msra.mxu0 %v2196_v14  ;;  %1614 = vmatprep.subr.mxu1 %v2125_v0  ;;  %v2338_v45 = vld [vmem:[#allocation8 + $0x18] sm:$0xff]  ;;  %v2342_v46 = vld [vmem:[#allocation8 + $0x10] sm:$0xff]  ;;  %v2346_v47 = vld [vmem:[#allocation8 + $0x8] sm:$0xff] }
  0x39   :  { %127 = vmatprep.subr.mxu0 %v2199_v15  ;;  %1615 = vmatpush3.msra.mxu1 %v2298_v35  ;;  %2928 = vst [vmem:[#allocation13_spill] sm:$0xff] %v2346_v47  ;;  %v2350_v48 = vld [vmem:[#allocation8] sm:$0xff]  ;;  %v111_v50 = vld [vmem:[#allocation3 + $0x8] sm:$0xff]  ;;  %v112_v63 = vld [vmem:[#allocation3 + $0x10] sm:$0xff] }
  0x3a   :  { %128 = vmatpush1.msra.mxu0 %v2202_v16  ;;  %1616 = vmatprep.subr.mxu1 %v2125_v0  ;;  %2929 = vst [vmem:[#allocation14_spill] sm:$0xff] %v2350_v48  ;;  %v110_v58 = vld [vmem:[#allocation3] sm:$0xff] }
  0x3b   :  { %129 = vmatprep.subr.mxu0 %v2205_v17  ;;  %1617 = vmatpush3.msra.mxu1 %v2302_v36 }
  0x3c   :  { %130 = vmatpush1.msra.mxu0 %v2208_v18  ;;  %1618 = vmatprep.subr.mxu1 %v2125_v0 }
  0x3d   :  { %131 = vmatprep.subr.mxu0 %v2211_v19  ;;  %1619 = vmatpush3.msra.mxu1 %v2306_v37 }
  0x3e   :  { %132 = vmatpush1.msra.mxu0 %v2214_v20  ;;  %1620 = vmatprep.subr.mxu1 %v2125_v0 }
  0x3f   :  { %133 = vmatprep.subr.mxu0 %v2217_v21  ;;  %1621 = vmatpush3.msra.mxu1 %v2310_v38 }
  0x40   :  { %134 = vmatpush1.msra.mxu0 %v2220_v22  ;;  %1622 = vmatprep.subr.mxu1 %v2125_v0 }
  0x41   :  { %135 = vmatprep.subr.mxu0 %v2223_v23  ;;  %1623 = vmatpush3.msra.mxu1 %v2314_v39 }
  0x42   :  { %136 = vmatpush1.msra.mxu0 %v2226_v24  ;;  %1624 = vmatprep.subr.mxu1 %v2125_v0 }
  0x43   :  { %137 = vmatprep.subr.mxu0 %v2229_v25  ;;  %1625 = vmatpush3.msra.mxu1 %v2318_v40 }
  0x44   :  { %138 = vmatpush1.msra.mxu0 %v2232_v26  ;;  %1626 = vmatprep.subr.mxu1 %v2125_v0 }
  0x45   :  { %139 = vmatprep.subr.mxu0 %v2235_v27  ;;  %1627 = vmatpush3.msra.mxu1 %v2322_v41 }
  0x46   :  { %140 = vmatpush1.msra.mxu0 %v2238_v28  ;;  %1628 = vmatprep.subr.mxu1 %v2125_v0 }
  0x47   :  { %141 = vmatprep.subr.mxu0 %v2241_v29  ;;  %1629 = vmatpush3.msra.mxu1 %v2324_v42 }
  0x48   :  { %142 = vmatpush1.msra.mxu0 %v2244_v30  ;;  %1630 = vmatprep.subr.mxu1 %v2125_v0 }
  0x49   :  { %143 = vmatprep.subr.mxu0 %v2247_v31  ;;  %1631 = vmatpush3.msra.mxu1 %v2330_v43 }
  0x4a   :  { %144 = vmatpush1.msra.mxu0 %v2250_v32  ;;  %1632 = vmatprep.subr.mxu1 %v2125_v0 }
  0x4b   :  { %178 = vmatmul.mubr.f32.vlgmr.msra.gmra.mxu0 %v2125_v0  ;;  %279 = vmatprep.subr.mxu0 %v2159_v1 }
  0x4c   :  { %280 = vmatpush1.msra.mxu0 %v2161_v2  ;;  %343 = vmatprep.mubr.f32.mxu0 %v2125_v0 }
  0x4d   :  { %281 = vmatprep.subr.mxu0 %v2163_v3  ;;  %1633 = vmatpush3.msra.mxu1 %v2334_v44 }
  0x4e   :  { %282 = vmatpush1.msra.mxu0 %v2166_v4  ;;  %1634 = vmatprep.subr.mxu1 %v2125_v0 }
  0x4f   :  { %283 = vmatprep.subr.mxu0 %v2169_v5  ;;  %1635 = vmatpush3.msra.mxu1 %v2338_v45 }
  0x50   :  { %284 = vmatpush1.msra.mxu0 %v2172_v6  ;;  %1636 = vmatprep.subr.mxu1 %v2125_v0 }
  0x51   :  { %285 = vmatprep.subr.mxu0 %v2175_v7  ;;  %1637 = vmatpush3.msra.mxu1 %v2342_v46 }
  0x52   :  { %286 = vmatpush1.msra.mxu0 %v2178_v8  ;;  %1638 = vmatprep.subr.mxu1 %v2125_v0 }
  0x53   :  { %287 = vmatprep.subr.mxu0 %v2181_v9  ;;  %1639 = vmatpush3.msra.mxu1 %v2346_v47 }
  0x54   :  { %288 = vmatpush1.msra.mxu0 %v2184_v10  ;;  %1640 = vmatprep.subr.mxu1 %v2125_v0 }
  0x55   :  { %289 = vmatprep.subr.mxu0 %v2187_v11  ;;  %1641 = vmatpush3.msra.mxu1 %v2350_v48 }
  0x56   :  { %290 = vmatpush1.msra.mxu0 %v2190_v12  ;;  %1645 = vmatprep.subr.mxu1 %v2125_v0 }
  0x57   :  { %291 = vmatprep.subr.mxu0 %v2193_v13 }
  0x58   :  { %292 = vmatpush1.msra.mxu0 %v2196_v14 }
  0x59   :  { %293 = vmatprep.subr.mxu0 %v2199_v15 }
  0x5a   :  { %294 = vmatpush1.msra.mxu0 %v2202_v16 }
  0x5b   :  { %295 = vmatprep.subr.mxu0 %v2205_v17 }
  0x5c   :  { %296 = vmatpush1.msra.mxu0 %v2208_v18 }
  0x5d   :  { %297 = vmatprep.subr.mxu0 %v2211_v19 }
  0x5e   :  { %298 = vmatpush1.msra.mxu0 %v2214_v20 }
  0x5f   :  { %299 = vmatprep.subr.mxu0 %v2217_v21 }
  0x60   :  { %300 = vmatpush1.msra.mxu0 %v2220_v22 }
  0x61   :  { %301 = vmatprep.subr.mxu0 %v2223_v23 }
  0x62   :  { %302 = vmatpush1.msra.mxu0 %v2226_v24 }
  0x63   :  { %303 = vmatprep.subr.mxu0 %v2229_v25 }
  0x64   :  { %304 = vmatpush1.msra.mxu0 %v2232_v26 }
  0x65   :  { %305 = vmatprep.subr.mxu0 %v2235_v27 }
  0x66   :  { %306 = vmatpush1.msra.mxu0 %v2238_v28 }
  0x67   :  { %307 = vmatprep.subr.mxu0 %v2241_v29 }
  0x68   :  { %308 = vmatpush1.msra.mxu0 %v2244_v30 }
  0x69   :  { %309 = vmatprep.subr.mxu0 %v2247_v31 }
  0x6a   :  { %310 = vmatpush1.msra.mxu0 %v2250_v32 }
  0x6b   :  { %445 = vmatprep.subr.mxu0 %v2159_v1 }
 0x10b   :  { %v179_v49 = vpop.f32.mrf.mxu0 }
 0x10c   :  { %v184_v59 = vadd.f32 %v179_v49, %v110_v58  ;;  %v277_v58 = vld [vmem:[#allocation3 + $0x20] sm:$0xff] }
 0x10d   :  { %v181_v51 = vpop.f32.mrf.mxu0 }
 0x10e   :  { %v191_v52 = vadd.f32 %v181_v51, %v111_v50  ;;  %v1458_v60 = vmul.f32 -1.442695, %v184_v59 }
 0x110   :  { %v1459_v53 = vmul.f32 -1.442695, %v191_v52 }
 0x112   :  { %1902 = vpow2.f32 %v1459_v53 }
 0x11f   :  { %v1903_v54 = vpop.eup %1902 }
 0x120   :  { %v195_v55 = vadd.f32 1.0, %v1903_v54 }
 0x122   :  { %1904 = vrcp.f32 %v195_v55 }
 0x123   :  { %1906 = vpow2.f32 %v1458_v60 }
 0x12f   :  { %v1905_v56 = vpop.eup %1904 }
 0x130   :  { %v198_v57 = vmul.f32 0.0, %v1905_v56  ;;  %v1907_v61 = vpop.eup %1906 }
 0x131   :  { %v188_v62 = vadd.f32 1.0, %v1907_v61 }
 0x132   :  { %1643 = vmatmul.mubr.f32.vlgmr.msra.gmra.mxu1 %v198_v57 }
 0x133   :  { %1646 = vmatpush3.msra.mxu1 %v2290_v33  ;;  %1677 = vmatprep.mubr.msk.f32.mxu1 %vm2126_vm0, %v2125_v0  ;;  %1908 = vrcp.f32 %v188_v62 }
 0x134   :  { %1647 = vmatprep.subr.mxu1 %v2125_v0 }
 0x135   :  { %1648 = vmatpush3.msra.mxu1 %v2294_v34 }
 0x136   :  { %1649 = vmatprep.subr.mxu1 %v2125_v0 }
 0x137   :  { %1650 = vmatpush3.msra.mxu1 %v2298_v35 }
 0x138   :  { %1651 = vmatprep.subr.mxu1 %v2125_v0 }
 0x139   :  { %1652 = vmatpush3.msra.mxu1 %v2302_v36 }
 0x13a   :  { %1653 = vmatprep.subr.mxu1 %v2125_v0 }
 0x13b   :  { %1654 = vmatpush3.msra.mxu1 %v2306_v37 }
 0x13c   :  { %1655 = vmatprep.subr.mxu1 %v2125_v0 }
 0x13d   :  { %1656 = vmatpush3.msra.mxu1 %v2310_v38 }
 0x13e   :  { %1657 = vmatprep.subr.mxu1 %v2125_v0 }
 0x13f   :  { %1658 = vmatpush3.msra.mxu1 %v2314_v39 }
 0x140   :  { %1659 = vmatprep.subr.mxu1 %v2125_v0  ;;  %v1909_v53 = vpop.eup %1908 }
 0x141   :  { %1660 = vmatpush3.msra.mxu1 %v2318_v40  ;;  %v271_v54 = vsub.f32 1.0, %v1909_v53 }
 0x142   :  { %1661 = vmatprep.subr.mxu1 %v2125_v0 }
 0x143   :  { %1662 = vmatpush3.msra.mxu1 %v2322_v41  ;;  %v272_v56 = vmul.f32 0.0, %v271_v54 }
 0x144   :  { %1663 = vmatprep.subr.mxu1 %v2125_v0 }
 0x145   :  { %1664 = vmatpush3.msra.mxu1 %v2324_v42 }
 0x146   :  { %1665 = vmatprep.subr.mxu1 %v2125_v0 }
 0x147   :  { %1666 = vmatpush3.msra.mxu1 %v2330_v43 }
 0x148   :  { %1667 = vmatprep.subr.mxu1 %v2125_v0 }
 0x149   :  { %1668 = vmatpush3.msra.mxu1 %v2334_v44 }
 0x14a   :  { %1669 = vmatprep.subr.mxu1 %v2125_v0 }
 0x14b   :  { %1670 = vmatpush3.msra.mxu1 %v2338_v45 }
 0x14c   :  { %1671 = vmatprep.subr.mxu1 %v2125_v0 }
 0x14d   :  { %1672 = vmatpush3.msra.mxu1 %v2342_v46 }
 0x14e   :  { %1673 = vmatprep.subr.mxu1 %v2125_v0 }
 0x14f   :  { %1674 = vmatpush3.msra.mxu1 %v2346_v47 }
 0x150   :  { %1675 = vmatprep.subr.mxu1 %v2125_v0 }
 0x151   :  { %1676 = vmatpush3.msra.mxu1 %v2350_v48 }
 0x152   :  { %1680 = vmatprep.subr.mxu1 %v2125_v0 }
 0x1f2   :  { %v265_v50 = vpop.f32.mrf.mxu1 }
 0x1f3   :  { %v269_v51 = vadd.f32 %v265_v50, %v112_v63 }
 0x1f4   :  { %v1644_v52 = vpop.f32.mrf.mxu1 }
 0x1f5   :  { %1910 = vtanh.f32 %v269_v51  ;;  %v2930_v52 = vld [vmem:[#allocation14_spill] sm:$0xff] }
 0x202   :  { %v1911_v55 = vpop.eup %1910 }
 0x203   :  { %v273_v57 = vmul.f32 %v1911_v55, %v1909_v53  ;;  %v276_v53 = vld [vmem:[#allocation3 + $0x18] sm:$0xff] }
 0x205   :  { %v2390_v48 = vadd.f32 %v273_v57, %v272_v56 }
 0x207   :  { %344 = vmatmul.mubr.f32.vlgmr.msra.gmra.mxu0 %v2390_v48 }
 0x208   :  { %446 = vmatpush1.msra.mxu0 %v2161_v2  ;;  %509 = vmatprep.mubr.f32.mxu0 %v2125_v0 }
 0x209   :  { %447 = vmatprep.subr.mxu0 %v2163_v3 }
 0x20a   :  { %448 = vmatpush1.msra.mxu0 %v2166_v4 }
 0x20b   :  { %449 = vmatprep.subr.mxu0 %v2169_v5 }
 0x20c   :  { %450 = vmatpush1.msra.mxu0 %v2172_v6 }
 0x20d   :  { %451 = vmatprep.subr.mxu0 %v2175_v7 }
 0x20e   :  { %452 = vmatpush1.msra.mxu0 %v2178_v8 }
 0x20f   :  { %453 = vmatprep.subr.mxu0 %v2181_v9 }
 0x210   :  { %454 = vmatpush1.msra.mxu0 %v2184_v10 }
 0x211   :  { %455 = vmatprep.subr.mxu0 %v2187_v11 }
 0x212   :  { %456 = vmatpush1.msra.mxu0 %v2190_v12 }
 0x213   :  { %457 = vmatprep.subr.mxu0 %v2193_v13 }
 0x214   :  { %458 = vmatpush1.msra.mxu0 %v2196_v14 }
 0x215   :  { %459 = vmatprep.subr.mxu0 %v2199_v15 }
 0x216   :  { %460 = vmatpush1.msra.mxu0 %v2202_v16 }
 0x217   :  { %461 = vmatprep.subr.mxu0 %v2205_v17 }
 0x218   :  { %462 = vmatpush1.msra.mxu0 %v2208_v18 }
 0x219   :  { %463 = vmatprep.subr.mxu0 %v2211_v19 }
 0x21a   :  { %464 = vmatpush1.msra.mxu0 %v2214_v20 }
 0x21b   :  { %465 = vmatprep.subr.mxu0 %v2217_v21 }
 0x21c   :  { %466 = vmatpush1.msra.mxu0 %v2220_v22 }
 0x21d   :  { %467 = vmatprep.subr.mxu0 %v2223_v23 }
 0x21e   :  { %468 = vmatpush1.msra.mxu0 %v2226_v24 }
 0x21f   :  { %469 = vmatprep.subr.mxu0 %v2229_v25 }
 0x220   :  { %470 = vmatpush1.msra.mxu0 %v2232_v26 }
 0x221   :  { %471 = vmatprep.subr.mxu0 %v2235_v27 }
 0x222   :  { %472 = vmatpush1.msra.mxu0 %v2238_v28 }
 0x223   :  { %473 = vmatprep.subr.mxu0 %v2241_v29 }
 0x224   :  { %474 = vmatpush1.msra.mxu0 %v2244_v30 }
 0x225   :  { %475 = vmatprep.subr.mxu0 %v2247_v31 }
 0x226   :  { %476 = vmatpush1.msra.mxu0 %v2250_v32 }
 0x227   :  { %611 = vmatprep.subr.mxu0 %v2159_v1 }
 0x2c7   :  { %v345_v49 = vpop.f32.mrf.mxu0 }
 0x2c8   :  { %v350_v54 = vadd.f32 %v345_v49, %v276_v53  ;;  %v443_v49 = vld [vmem:[#allocation3 + $0x38] sm:$0xff] }
 0x2c9   :  { %v347_v59 = vpop.f32.mrf.mxu0 }
 0x2ca   :  { %v357_v60 = vadd.f32 %v347_v59, %v277_v58  ;;  %v1460_v55 = vmul.f32 -1.442695, %v350_v54  ;;  %v278_v58 = vld [vmem:[#allocation3 + $0x28] sm:$0xff] }
 0x2cc   :  { %v1461_v61 = vmul.f32 -1.442695, %v357_v60 }
 0x2ce   :  { %1912 = vpow2.f32 %v1461_v61 }
 0x2db   :  { %v1913_v62 = vpop.eup %1912 }
 0x2dc   :  { %v361_v63 = vadd.f32 1.0, %v1913_v62 }
 0x2de   :  { %1914 = vrcp.f32 %v361_v63 }
 0x2df   :  { %1916 = vpow2.f32 %v1460_v55 }
 0x2eb   :  { %v1915_v50 = vpop.eup %1914 }
 0x2ec   :  { %v364_v51 = vmul.f32 %v1915_v50, %v2390_v48  ;;  %v1917_v56 = vpop.eup %1916 }
 0x2ed   :  { %v354_v57 = vadd.f32 1.0, %v1917_v56 }
 0x2ee   :  { %1678 = vmatmul.mubr.f32.vlgmr.msra.gmra.mxu1 %v364_v51 }
 0x2ef   :  { %1681 = vmatpush3.msra.mxu1 %v2290_v33  ;;  %1712 = vmatprep.mubr.msk.f32.mxu1 %vm2126_vm0, %v2125_v0  ;;  %1918 = vrcp.f32 %v354_v57 }
 0x2f0   :  { %1682 = vmatprep.subr.mxu1 %v2125_v0 }
 0x2f1   :  { %1683 = vmatpush3.msra.mxu1 %v2294_v34 }
 0x2f2   :  { %1684 = vmatprep.subr.mxu1 %v2125_v0 }
 0x2f3   :  { %1685 = vmatpush3.msra.mxu1 %v2298_v35 }
 0x2f4   :  { %1686 = vmatprep.subr.mxu1 %v2125_v0 }
 0x2f5   :  { %1687 = vmatpush3.msra.mxu1 %v2302_v36 }
 0x2f6   :  { %1688 = vmatprep.subr.mxu1 %v2125_v0 }
 0x2f7   :  { %1689 = vmatpush3.msra.mxu1 %v2306_v37 }
 0x2f8   :  { %1690 = vmatprep.subr.mxu1 %v2125_v0 }
 0x2f9   :  { %1691 = vmatpush3.msra.mxu1 %v2310_v38 }
 0x2fa   :  { %1692 = vmatprep.subr.mxu1 %v2125_v0 }
 0x2fb   :  { %1693 = vmatpush3.msra.mxu1 %v2314_v39 }
 0x2fc   :  { %1694 = vmatprep.subr.mxu1 %v2125_v0  ;;  %v1919_v62 = vpop.eup %1918 }
 0x2fd   :  { %1695 = vmatpush3.msra.mxu1 %v2318_v40  ;;  %v437_v63 = vsub.f32 1.0, %v1919_v62 }
 0x2fe   :  { %1696 = vmatprep.subr.mxu1 %v2125_v0 }
 0x2ff   :  { %1697 = vmatpush3.msra.mxu1 %v2322_v41  ;;  %v438_v51 = vmul.f32 %v437_v63, %v2390_v48 }
 0x300   :  { %1698 = vmatprep.subr.mxu1 %v2125_v0 }
 0x301   :  { %1699 = vmatpush3.msra.mxu1 %v2324_v42 }
 0x302   :  { %1700 = vmatprep.subr.mxu1 %v2125_v0 }
 0x303   :  { %1701 = vmatpush3.msra.mxu1 %v2330_v43 }
 0x304   :  { %1702 = vmatprep.subr.mxu1 %v2125_v0 }
 0x305   :  { %1703 = vmatpush3.msra.mxu1 %v2334_v44 }
 0x306   :  { %1704 = vmatprep.subr.mxu1 %v2125_v0 }
 0x307   :  { %1705 = vmatpush3.msra.mxu1 %v2338_v45 }
 0x308   :  { %1706 = vmatprep.subr.mxu1 %v2125_v0 }
 0x309   :  { %1707 = vmatpush3.msra.mxu1 %v2342_v46 }
 0x30a   :  { %1708 = vmatprep.subr.mxu1 %v2125_v0 }
 0x30b   :  { %1709 = vmatpush3.msra.mxu1 %v2346_v47 }
 0x30c   :  { %1710 = vmatprep.subr.mxu1 %v2125_v0 }
 0x30d   :  { %1711 = vmatpush3.msra.mxu1 %v2930_v52 }
 0x30e   :  { %1715 = vmatprep.subr.mxu1 %v2125_v0 }
 0x3ae   :  { %v431_v59 = vpop.f32.mrf.mxu1 }
 0x3af   :  { %v435_v60 = vadd.f32 %v431_v59, %v278_v58  ;;  %v2931_v59 = vld [vmem:[#allocation13_spill] sm:$0xff] }
 0x3b0   :  { %v1679_v61 = vpop.f32.mrf.mxu1 }
 0x3b1   :  { %1920 = vtanh.f32 %v435_v60  ;;  %v2932_v60 = vld [vmem:[#allocation14_spill] sm:$0xff] }
 0x3b2   :  { %v442_v61 = vld [vmem:[#allocation3 + $0x30] sm:$0xff] }
 0x3be   :  { %v1921_v50 = vpop.eup %1920 }
 0x3bf   :  { %v439_v52 = vmul.f32 %v1921_v50, %v1919_v62 }
 0x3c1   :  { %v2462_v47 = vadd.f32 %v439_v52, %v438_v51 }
 0x3c3   :  { %510 = vmatmul.mubr.f32.vlgmr.msra.gmra.mxu0 %v2462_v47 }
 0x3c4   :  { %612 = vmatpush1.msra.mxu0 %v2161_v2  ;;  %675 = vmatprep.mubr.f32.mxu0 %v2125_v0 }
 0x3c5   :  { %613 = vmatprep.subr.mxu0 %v2163_v3 }
 0x3c6   :  { %614 = vmatpush1.msra.mxu0 %v2166_v4 }
 0x3c7   :  { %615 = vmatprep.subr.mxu0 %v2169_v5 }
 0x3c8   :  { %616 = vmatpush1.msra.mxu0 %v2172_v6 }
 0x3c9   :  { %617 = vmatprep.subr.mxu0 %v2175_v7 }
 0x3ca   :  { %618 = vmatpush1.msra.mxu0 %v2178_v8 }
 0x3cb   :  { %619 = vmatprep.subr.mxu0 %v2181_v9 }
 0x3cc   :  { %620 = vmatpush1.msra.mxu0 %v2184_v10 }
 0x3cd   :  { %621 = vmatprep.subr.mxu0 %v2187_v11 }
 0x3ce   :  { %622 = vmatpush1.msra.mxu0 %v2190_v12 }
 0x3cf   :  { %623 = vmatprep.subr.mxu0 %v2193_v13 }
 0x3d0   :  { %624 = vmatpush1.msra.mxu0 %v2196_v14 }
 0x3d1   :  { %625 = vmatprep.subr.mxu0 %v2199_v15 }
 0x3d2   :  { %626 = vmatpush1.msra.mxu0 %v2202_v16 }
 0x3d3   :  { %627 = vmatprep.subr.mxu0 %v2205_v17 }
 0x3d4   :  { %628 = vmatpush1.msra.mxu0 %v2208_v18 }
 0x3d5   :  { %629 = vmatprep.subr.mxu0 %v2211_v19 }
 0x3d6   :  { %630 = vmatpush1.msra.mxu0 %v2214_v20 }
 0x3d7   :  { %631 = vmatprep.subr.mxu0 %v2217_v21 }
 0x3d8   :  { %632 = vmatpush1.msra.mxu0 %v2220_v22 }
 0x3d9   :  { %633 = vmatprep.subr.mxu0 %v2223_v23 }
 0x3da   :  { %634 = vmatpush1.msra.mxu0 %v2226_v24 }
 0x3db   :  { %635 = vmatprep.subr.mxu0 %v2229_v25 }
 0x3dc   :  { %636 = vmatpush1.msra.mxu0 %v2232_v26 }
 0x3dd   :  { %637 = vmatprep.subr.mxu0 %v2235_v27 }
 0x3de   :  { %638 = vmatpush1.msra.mxu0 %v2238_v28 }
 0x3df   :  { %639 = vmatprep.subr.mxu0 %v2241_v29 }
 0x3e0   :  { %640 = vmatpush1.msra.mxu0 %v2244_v30 }
 0x3e1   :  { %641 = vmatprep.subr.mxu0 %v2247_v31 }
 0x3e2   :  { %642 = vmatpush1.msra.mxu0 %v2250_v32 }
 0x3e3   :  { %777 = vmatprep.subr.mxu0 %v2159_v1 }
 0x483   :  { %v511_v48 = vpop.f32.mrf.mxu0 }
 0x484   :  { %v516_v62 = vadd.f32 %v511_v48, %v442_v61  ;;  %v609_v48 = vld [vmem:[#allocation3 + $0x50] sm:$0xff] }
 0x485   :  { %v513_v52 = vpop.f32.mrf.mxu0 }
 0x486   :  { %v523_v53 = vadd.f32 %v513_v52, %v443_v49  ;;  %v1462_v63 = vmul.f32 -1.442695, %v516_v62  ;;  %v444_v49 = vld [vmem:[#allocation3 + $0x40] sm:$0xff] }
 0x488   :  { %v1463_v54 = vmul.f32 -1.442695, %v523_v53 }
 0x48a   :  { %1922 = vpow2.f32 %v1463_v54 }
 0x497   :  { %v1923_v55 = vpop.eup %1922 }
 0x498   :  { %v527_v56 = vadd.f32 1.0, %v1923_v55 }
 0x49a   :  { %1924 = vrcp.f32 %v527_v56 }
 0x49b   :  { %1926 = vpow2.f32 %v1462_v63 }
 0x4a7   :  { %v1925_v57 = vpop.eup %1924 }
 0x4a8   :  { %v530_v58 = vmul.f32 %v1925_v57, %v2462_v47  ;;  %v1927_v50 = vpop.eup %1926 }
 0x4a9   :  { %v520_v51 = vadd.f32 1.0, %v1927_v50 }
 0x4aa   :  { %1713 = vmatmul.mubr.f32.vlgmr.msra.gmra.mxu1 %v530_v58 }
 0x4ab   :  { %1716 = vmatpush3.msra.mxu1 %v2290_v33  ;;  %1747 = vmatprep.mubr.msk.f32.mxu1 %vm2126_vm0, %v2125_v0  ;;  %1928 = vrcp.f32 %v520_v51 }
 0x4ac   :  { %1717 = vmatprep.subr.mxu1 %v2125_v0 }
 0x4ad   :  { %1718 = vmatpush3.msra.mxu1 %v2294_v34 }
 0x4ae   :  { %1719 = vmatprep.subr.mxu1 %v2125_v0 }
 0x4af   :  { %1720 = vmatpush3.msra.mxu1 %v2298_v35 }
 0x4b0   :  { %1721 = vmatprep.subr.mxu1 %v2125_v0 }
 0x4b1   :  { %1722 = vmatpush3.msra.mxu1 %v2302_v36 }
 0x4b2   :  { %1723 = vmatprep.subr.mxu1 %v2125_v0 }
 0x4b3   :  { %1724 = vmatpush3.msra.mxu1 %v2306_v37 }
 0x4b4   :  { %1725 = vmatprep.subr.mxu1 %v2125_v0 }
 0x4b5   :  { %1726 = vmatpush3.msra.mxu1 %v2310_v38 }
 0x4b6   :  { %1727 = vmatprep.subr.mxu1 %v2125_v0 }
 0x4b7   :  { %1728 = vmatpush3.msra.mxu1 %v2314_v39 }
 0x4b8   :  { %1729 = vmatprep.subr.mxu1 %v2125_v0  ;;  %v1929_v55 = vpop.eup %1928 }
 0x4b9   :  { %1730 = vmatpush3.msra.mxu1 %v2318_v40  ;;  %v603_v56 = vsub.f32 1.0, %v1929_v55 }
 0x4ba   :  { %1731 = vmatprep.subr.mxu1 %v2125_v0 }
 0x4bb   :  { %1732 = vmatpush3.msra.mxu1 %v2322_v41  ;;  %v604_v58 = vmul.f32 %v603_v56, %v2462_v47 }
 0x4bc   :  { %1733 = vmatprep.subr.mxu1 %v2125_v0 }
 0x4bd   :  { %1734 = vmatpush3.msra.mxu1 %v2324_v42 }
 0x4be   :  { %1735 = vmatprep.subr.mxu1 %v2125_v0 }
 0x4bf   :  { %1736 = vmatpush3.msra.mxu1 %v2330_v43 }
 0x4c0   :  { %1737 = vmatprep.subr.mxu1 %v2125_v0 }
 0x4c1   :  { %1738 = vmatpush3.msra.mxu1 %v2334_v44 }
 0x4c2   :  { %1739 = vmatprep.subr.mxu1 %v2125_v0 }
 0x4c3   :  { %1740 = vmatpush3.msra.mxu1 %v2338_v45 }
 0x4c4   :  { %1741 = vmatprep.subr.mxu1 %v2125_v0 }
 0x4c5   :  { %1742 = vmatpush3.msra.mxu1 %v2342_v46 }
 0x4c6   :  { %1743 = vmatprep.subr.mxu1 %v2125_v0 }
 0x4c7   :  { %1744 = vmatpush3.msra.mxu1 %v2931_v59 }
 0x4c8   :  { %1745 = vmatprep.subr.mxu1 %v2125_v0 }
 0x4c9   :  { %1746 = vmatpush3.msra.mxu1 %v2932_v60 }
 0x4ca   :  { %1750 = vmatprep.subr.mxu1 %v2125_v0 }
 0x56a   :  { %v597_v52 = vpop.f32.mrf.mxu1 }
 0x56b   :  { %v601_v53 = vadd.f32 %v597_v52, %v444_v49  ;;  %v2934_v52 = vld [vmem:[#allocation14_spill] sm:$0xff] }
 0x56c   :  { %v1714_v54 = vpop.f32.mrf.mxu1 }
 0x56d   :  { %1930 = vtanh.f32 %v601_v53  ;;  %v608_v53 = vld [vmem:[#allocation3 + $0x48] sm:$0xff] }
 0x57a   :  { %v1931_v57 = vpop.eup %1930 }
 0x57b   :  { %v605_v60 = vmul.f32 %v1931_v57, %v1929_v55 }
 0x57d   :  { %v2534_v59 = vadd.f32 %v605_v60, %v604_v58  ;;  %v610_v58 = vld [vmem:[#allocation3 + $0x58] sm:$0xff] }
 0x57f   :  { %676 = vmatmul.mubr.f32.vlgmr.msra.gmra.mxu0 %v2534_v59 }
 0x580   :  { %778 = vmatpush1.msra.mxu0 %v2161_v2  ;;  %841 = vmatprep.mubr.f32.mxu0 %v2125_v0 }
 0x581   :  { %779 = vmatprep.subr.mxu0 %v2163_v3 }
 0x582   :  { %780 = vmatpush1.msra.mxu0 %v2166_v4 }
 0x583   :  { %781 = vmatprep.subr.mxu0 %v2169_v5 }
 0x584   :  { %782 = vmatpush1.msra.mxu0 %v2172_v6 }
 0x585   :  { %783 = vmatprep.subr.mxu0 %v2175_v7 }
 0x586   :  { %784 = vmatpush1.msra.mxu0 %v2178_v8 }
 0x587   :  { %785 = vmatprep.subr.mxu0 %v2181_v9 }
 0x588   :  { %786 = vmatpush1.msra.mxu0 %v2184_v10 }
 0x589   :  { %787 = vmatprep.subr.mxu0 %v2187_v11 }
 0x58a   :  { %788 = vmatpush1.msra.mxu0 %v2190_v12 }
 0x58b   :  { %789 = vmatprep.subr.mxu0 %v2193_v13 }
 0x58c   :  { %790 = vmatpush1.msra.mxu0 %v2196_v14 }
 0x58d   :  { %791 = vmatprep.subr.mxu0 %v2199_v15 }
 0x58e   :  { %792 = vmatpush1.msra.mxu0 %v2202_v16 }
 0x58f   :  { %793 = vmatprep.subr.mxu0 %v2205_v17 }
 0x590   :  { %794 = vmatpush1.msra.mxu0 %v2208_v18 }
 0x591   :  { %795 = vmatprep.subr.mxu0 %v2211_v19 }
 0x592   :  { %796 = vmatpush1.msra.mxu0 %v2214_v20 }
 0x593   :  { %797 = vmatprep.subr.mxu0 %v2217_v21 }
 0x594   :  { %798 = vmatpush1.msra.mxu0 %v2220_v22 }
 0x595   :  { %799 = vmatprep.subr.mxu0 %v2223_v23 }
 0x596   :  { %800 = vmatpush1.msra.mxu0 %v2226_v24 }
 0x597   :  { %801 = vmatprep.subr.mxu0 %v2229_v25 }
 0x598   :  { %802 = vmatpush1.msra.mxu0 %v2232_v26 }
 0x599   :  { %803 = vmatprep.subr.mxu0 %v2235_v27 }
 0x59a   :  { %804 = vmatpush1.msra.mxu0 %v2238_v28 }
 0x59b   :  { %805 = vmatprep.subr.mxu0 %v2241_v29 }
 0x59c   :  { %806 = vmatpush1.msra.mxu0 %v2244_v30 }
 0x59d   :  { %807 = vmatprep.subr.mxu0 %v2247_v31 }
 0x59e   :  { %808 = vmatpush1.msra.mxu0 %v2250_v32 }
 0x59f   :  { %943 = vmatprep.subr.mxu0 %v2159_v1  ;;  %v2933_v1 = vld [vmem:[#allocation13_spill] sm:$0xff] }
 0x63f   :  { %v677_v47 = vpop.f32.mrf.mxu0 }
 0x640   :  { %v682_v54 = vadd.f32 %v677_v47, %v608_v53  ;;  %v2744_v47 = vld [vmem:[#allocation6 + $0x50] sm:$0xff]  ;;  %v2753_v53 = vld [vmem:[#allocation6 + $0x38] sm:$0xff] }
 0x641   :  { %v679_v60 = vpop.f32.mrf.mxu0 }
 0x642   :  { %v689_v61 = vadd.f32 %v679_v60, %v609_v48  ;;  %v1464_v55 = vmul.f32 -1.442695, %v682_v54  ;;  %v2756_v54 = vld [vmem:[#allocation6 + $0x30] sm:$0xff] }
 0x644   :  { %v1465_v62 = vmul.f32 -1.442695, %v689_v61 }
 0x646   :  { %1932 = vpow2.f32 %v1465_v62 }
 0x653   :  { %v1933_v63 = vpop.eup %1932 }
 0x654   :  { %v693_v50 = vadd.f32 1.0, %v1933_v63 }
 0x656   :  { %1934 = vrcp.f32 %v693_v50 }
 0x657   :  { %1936 = vpow2.f32 %v1464_v55  ;;  %v2759_v55 = vld [vmem:[#allocation6 + $0x28] sm:$0xff] }
 0x663   :  { %v1935_v51 = vpop.eup %1934 }
 0x664   :  { %v696_v49 = vmul.f32 %v1935_v51, %v2534_v59  ;;  %v1937_v56 = vpop.eup %1936 }
 0x665   :  { %v686_v57 = vadd.f32 1.0, %v1937_v56  ;;  %v2762_v56 = vld [vmem:[#allocation6 + $0x20] sm:$0xff] }
 0x666   :  { %1748 = vmatmul.mubr.f32.vlgmr.msra.gmra.mxu1 %v696_v49 }
 0x667   :  { %1751 = vmatpush3.msra.mxu1 %v2290_v33  ;;  %1782 = vmatprep.mubr.msk.f32.mxu1 %vm2126_vm0, %v2125_v0  ;;  %1938 = vrcp.f32 %v686_v57  ;;  %v2765_v57 = vld [vmem:[#allocation6 + $0x18] sm:$0xff] }
 0x668   :  { %1752 = vmatprep.subr.mxu1 %v2125_v0 }
 0x669   :  { %1753 = vmatpush3.msra.mxu1 %v2294_v34 }
 0x66a   :  { %1754 = vmatprep.subr.mxu1 %v2125_v0 }
 0x66b   :  { %1755 = vmatpush3.msra.mxu1 %v2298_v35 }
 0x66c   :  { %1756 = vmatprep.subr.mxu1 %v2125_v0 }
 0x66d   :  { %1757 = vmatpush3.msra.mxu1 %v2302_v36 }
 0x66e   :  { %1758 = vmatprep.subr.mxu1 %v2125_v0 }
 0x66f   :  { %1759 = vmatpush3.msra.mxu1 %v2306_v37 }
 0x670   :  { %1760 = vmatprep.subr.mxu1 %v2125_v0 }
 0x671   :  { %1761 = vmatpush3.msra.mxu1 %v2310_v38 }
 0x672   :  { %1762 = vmatprep.subr.mxu1 %v2125_v0 }
 0x673   :  { %1763 = vmatpush3.msra.mxu1 %v2314_v39 }
 0x674   :  { %1764 = vmatprep.subr.mxu1 %v2125_v0  ;;  %v1939_v62 = vpop.eup %1938 }
 0x675   :  { %1765 = vmatpush3.msra.mxu1 %v2318_v40  ;;  %v769_v63 = vsub.f32 1.0, %v1939_v62 }
 0x676   :  { %1766 = vmatprep.subr.mxu1 %v2125_v0 }
 0x677   :  { %1767 = vmatpush3.msra.mxu1 %v2322_v41  ;;  %v770_v51 = vmul.f32 %v769_v63, %v2534_v59  ;;  %v2741_v59 = vld [vmem:[#allocation6 + $0x58] sm:$0xff] }
 0x678   :  { %1768 = vmatprep.subr.mxu1 %v2125_v0 }
 0x679   :  { %1769 = vmatpush3.msra.mxu1 %v2324_v42 }
 0x67a   :  { %1770 = vmatprep.subr.mxu1 %v2125_v0 }
 0x67b   :  { %1771 = vmatpush3.msra.mxu1 %v2330_v43 }
 0x67c   :  { %1772 = vmatprep.subr.mxu1 %v2125_v0 }
 0x67d   :  { %1773 = vmatpush3.msra.mxu1 %v2334_v44 }
 0x67e   :  { %1774 = vmatprep.subr.mxu1 %v2125_v0 }
 0x67f   :  { %1775 = vmatpush3.msra.mxu1 %v2338_v45 }
 0x680   :  { %1776 = vmatprep.subr.mxu1 %v2125_v0 }
 0x681   :  { %1777 = vmatpush3.msra.mxu1 %v2342_v46 }
 0x682   :  { %1778 = vmatprep.subr.mxu1 %v2125_v0 }
 0x683   :  { %1779 = vmatpush3.msra.mxu1 %v2933_v1 }
 0x684   :  { %1780 = vmatprep.subr.mxu1 %v2125_v0 }
 0x685   :  { %1781 = vmatpush3.msra.mxu1 %v2934_v52 }
 0x686   :  { %1785 = vmatprep.subr.mxu1 %v2125_v0 }
 0x726   :  { %v763_v48 = vpop.f32.mrf.mxu1 }
 0x727   :  { %v767_v60 = vadd.f32 %v763_v48, %v610_v58  ;;  %v2768_v58 = vld [vmem:[#allocation6 + $0x10] sm:$0xff]  ;;  %v2771_v48 = vld [vmem:[#allocation6 + $0x8] sm:$0xff] }
 0x728   :  { %v1749_v61 = vpop.f32.mrf.mxu1 }
 0x729   :  { %1940 = vtanh.f32 %v767_v60  ;;  %v2774_v60 = vld [vmem:[#allocation6] sm:$0xff] }
 0x736   :  { %v1941_v50 = vpop.eup %1940 }
 0x737   :  { %v771_v49 = vmul.f32 %v1941_v50, %v1939_v62  ;;  %v941_v62 = vld [vmem:[#allocation3 + $0x80] sm:$0xff] }
 0x739   :  { %v2606_v52 = vadd.f32 %v771_v49, %v770_v51 }
 0x73b   :  { %842 = vmatmul.mubr.f32.vlgmr.msra.gmra.mxu0 %v2606_v52 }
 0x73c   :  { %944 = vmatpush1.msra.mxu0 %v2161_v2  ;;  %1007 = vmatprep.mubr.f32.mxu0 %v2125_v0  ;;  %v2641_v2 = vld [vmem:[#allocation6 + $0xf8] sm:$0xff] }
 0x73d   :  { %945 = vmatprep.subr.mxu0 %v2163_v3 }
 0x73e   :  { %946 = vmatpush1.msra.mxu0 %v2166_v4  ;;  %v775_v4 = vld [vmem:[#allocation3 + $0x68] sm:$0xff] }
 0x73f   :  { %947 = vmatprep.subr.mxu0 %v2169_v5 }
 0x740   :  { %948 = vmatpush1.msra.mxu0 %v2172_v6 }
 0x741   :  { %949 = vmatprep.subr.mxu0 %v2175_v7 }
 0x742   :  { %950 = vmatpush1.msra.mxu0 %v2178_v8 }
 0x743   :  { %951 = vmatprep.subr.mxu0 %v2181_v9 }
 0x744   :  { %952 = vmatpush1.msra.mxu0 %v2184_v10 }
 0x745   :  { %953 = vmatprep.subr.mxu0 %v2187_v11 }
 0x746   :  { %954 = vmatpush1.msra.mxu0 %v2190_v12  ;;  %v2935_v12 = vld [vmem:[#allocation14_spill] sm:$0xff] }
 0x747   :  { %955 = vmatprep.subr.mxu0 %v2193_v13  ;;  %v774_v13 = vld [vmem:[#allocation3 + $0x60] sm:$0xff] }
 0x748   :  { %956 = vmatpush1.msra.mxu0 %v2196_v14 }
 0x749   :  { %957 = vmatprep.subr.mxu0 %v2199_v15 }
 0x74a   :  { %958 = vmatpush1.msra.mxu0 %v2202_v16 }
 0x74b   :  { %959 = vmatprep.subr.mxu0 %v2205_v17 }
 0x74c   :  { %960 = vmatpush1.msra.mxu0 %v2208_v18  ;;  %v776_v18 = vld [vmem:[#allocation3 + $0x70] sm:$0xff] }
 0x74d   :  { %961 = vmatprep.subr.mxu0 %v2211_v19 }
 0x74e   :  { %962 = vmatpush1.msra.mxu0 %v2214_v20 }
 0x74f   :  { %963 = vmatprep.subr.mxu0 %v2217_v21 }
 0x750   :  { %964 = vmatpush1.msra.mxu0 %v2220_v22 }
 0x751   :  { %965 = vmatprep.subr.mxu0 %v2223_v23 }
 0x752   :  { %966 = vmatpush1.msra.mxu0 %v2226_v24 }
 0x753   :  { %967 = vmatprep.subr.mxu0 %v2229_v25 }
 0x754   :  { %968 = vmatpush1.msra.mxu0 %v2232_v26 }
 0x755   :  { %969 = vmatprep.subr.mxu0 %v2235_v27 }
 0x756   :  { %970 = vmatpush1.msra.mxu0 %v2238_v28  ;;  %v2683_v28 = vld [vmem:[#allocation6 + $0xf0] sm:$0xff] }
 0x757   :  { %971 = vmatprep.subr.mxu0 %v2241_v29  ;;  %v2687_v29 = vld [vmem:[#allocation6 + $0xe8] sm:$0xff] }
 0x758   :  { %972 = vmatpush1.msra.mxu0 %v2244_v30  ;;  %v2690_v30 = vld [vmem:[#allocation6 + $0xe0] sm:$0xff] }
 0x759   :  { %973 = vmatprep.subr.mxu0 %v2247_v31  ;;  %v2693_v31 = vld [vmem:[#allocation6 + $0xd8] sm:$0xff] }
 0x75a   :  { %974 = vmatpush1.msra.mxu0 %v2250_v32  ;;  %v2696_v32 = vld [vmem:[#allocation6 + $0xd0] sm:$0xff] }
 0x75b   :  { %1109 = vmatprep.subr.mxu0 %v2641_v2 }
 0x7fb   :  { %v843_v3 = vpop.f32.mrf.mxu0 }
 0x7fc   :  { %v848_v14 = vadd.f32 %v843_v3, %v774_v13  ;;  %v2813_v13 = vld [vmem:[#allocation8 + $0x38] sm:$0xff] }
 0x7fd   :  { %v845_v5 = vpop.f32.mrf.mxu0 }
 0x7fe   :  { %v855_v6 = vadd.f32 %v845_v5, %v775_v4  ;;  %v1466_v15 = vmul.f32 -1.442695, %v848_v14  ;;  %v2817_v14 = vld [vmem:[#allocation8 + $0x30] sm:$0xff] }
 0x800   :  { %v1467_v7 = vmul.f32 -1.442695, %v855_v6  ;;  %v2779_v6 = vld [vmem:[#allocation8 + $0x78] sm:$0xff] }
 0x802   :  { %1942 = vpow2.f32 %v1467_v7  ;;  %v2789_v7 = vld [vmem:[#allocation8 + $0x68] sm:$0xff] }
 0x80f   :  { %v1943_v8 = vpop.eup %1942 }
 0x810   :  { %v859_v9 = vadd.f32 1.0, %v1943_v8  ;;  %v2793_v8 = vld [vmem:[#allocation8 + $0x60] sm:$0xff] }
 0x812   :  { %1944 = vrcp.f32 %v859_v9  ;;  %v2797_v9 = vld [vmem:[#allocation8 + $0x58] sm:$0xff] }
 0x813   :  { %1946 = vpow2.f32 %v1466_v15  ;;  %v2821_v15 = vld [vmem:[#allocation8 + $0x28] sm:$0xff] }
 0x81f   :  { %v1945_v10 = vpop.eup %1944 }
 0x820   :  { %v862_v11 = vmul.f32 %v1945_v10, %v2606_v52  ;;  %v1947_v16 = vpop.eup %1946  ;;  %v2801_v10 = vld [vmem:[#allocation8 + $0x50] sm:$0xff] }
 0x821   :  { %v852_v17 = vadd.f32 1.0, %v1947_v16  ;;  %v2825_v16 = vld [vmem:[#allocation8 + $0x20] sm:$0xff] }
 0x822   :  { %1783 = vmatmul.mubr.f32.vlgmr.msra.gmra.mxu1 %v862_v11  ;;  %v2805_v11 = vld [vmem:[#allocation8 + $0x48] sm:$0xff] }
 0x823   :  { %1786 = vmatpush3.msra.mxu1 %v2290_v33  ;;  %1817 = vmatprep.mubr.msk.f32.mxu1 %vm2126_vm0, %v2125_v0  ;;  %1948 = vrcp.f32 %v852_v17  ;;  %v2699_v33 = vld [vmem:[#allocation6 + $0xc8] sm:$0xff]  ;;  %v2829_v17 = vld [vmem:[#allocation8 + $0x18] sm:$0xff] }
 0x824   :  { %1787 = vmatprep.subr.mxu1 %v2125_v0 }
 0x825   :  { %1788 = vmatpush3.msra.mxu1 %v2294_v34  ;;  %v2702_v34 = vld [vmem:[#allocation6 + $0xc0] sm:$0xff] }
 0x826   :  { %1789 = vmatprep.subr.mxu1 %v2125_v0 }
 0x827   :  { %1790 = vmatpush3.msra.mxu1 %v2298_v35  ;;  %v2705_v35 = vld [vmem:[#allocation6 + $0xb8] sm:$0xff] }
 0x828   :  { %1791 = vmatprep.subr.mxu1 %v2125_v0 }
 0x829   :  { %1792 = vmatpush3.msra.mxu1 %v2302_v36  ;;  %v2708_v36 = vld [vmem:[#allocation6 + $0xb0] sm:$0xff] }
 0x82a   :  { %1793 = vmatprep.subr.mxu1 %v2125_v0 }
 0x82b   :  { %1794 = vmatpush3.msra.mxu1 %v2306_v37  ;;  %v2711_v37 = vld [vmem:[#allocation6 + $0xa8] sm:$0xff] }
 0x82c   :  { %1795 = vmatprep.subr.mxu1 %v2125_v0 }
 0x82d   :  { %1796 = vmatpush3.msra.mxu1 %v2310_v38  ;;  %v2714_v38 = vld [vmem:[#allocation6 + $0xa0] sm:$0xff] }
 0x82e   :  { %1797 = vmatprep.subr.mxu1 %v2125_v0 }
 0x82f   :  { %1798 = vmatpush3.msra.mxu1 %v2314_v39  ;;  %v2717_v39 = vld [vmem:[#allocation6 + $0x98] sm:$0xff] }
 0x830   :  { %1799 = vmatprep.subr.mxu1 %v2125_v0  ;;  %v1949_v22 = vpop.eup %1948 }
 0x831   :  { %1800 = vmatpush3.msra.mxu1 %v2318_v40  ;;  %v935_v23 = vsub.f32 1.0, %v1949_v22  ;;  %v2720_v40 = vld [vmem:[#allocation6 + $0x90] sm:$0xff] }
 0x832   :  { %1801 = vmatprep.subr.mxu1 %v2125_v0 }
 0x833   :  { %1802 = vmatpush3.msra.mxu1 %v2322_v41  ;;  %v936_v25 = vmul.f32 %v935_v23, %v2606_v52  ;;  %v2723_v41 = vld [vmem:[#allocation6 + $0x88] sm:$0xff]  ;;  %v2750_v52 = vld [vmem:[#allocation6 + $0x40] sm:$0xff] }
 0x834   :  { %1803 = vmatprep.subr.mxu1 %v2125_v0 }
 0x835   :  { %1804 = vmatpush3.msra.mxu1 %v2324_v42  ;;  %v2726_v42 = vld [vmem:[#allocation6 + $0x80] sm:$0xff] }
 0x836   :  { %1805 = vmatprep.subr.mxu1 %v2125_v0 }
 0x837   :  { %1806 = vmatpush3.msra.mxu1 %v2330_v43  ;;  %v2729_v43 = vld [vmem:[#allocation6 + $0x78] sm:$0xff] }
 0x838   :  { %1807 = vmatprep.subr.mxu1 %v2125_v0 }
 0x839   :  { %1808 = vmatpush3.msra.mxu1 %v2334_v44  ;;  %v2732_v44 = vld [vmem:[#allocation6 + $0x70] sm:$0xff] }
 0x83a   :  { %1809 = vmatprep.subr.mxu1 %v2125_v0 }
 0x83b   :  { %1810 = vmatpush3.msra.mxu1 %v2338_v45  ;;  %v2735_v45 = vld [vmem:[#allocation6 + $0x68] sm:$0xff] }
 0x83c   :  { %1811 = vmatprep.subr.mxu1 %v2125_v0 }
 0x83d   :  { %1812 = vmatpush3.msra.mxu1 %v2342_v46  ;;  %v2738_v46 = vld [vmem:[#allocation6 + $0x60] sm:$0xff] }
 0x83e   :  { %1813 = vmatprep.subr.mxu1 %v2125_v0 }
 0x83f   :  { %1814 = vmatpush3.msra.mxu1 %v2933_v1  ;;  %v2747_v1 = vld [vmem:[#allocation6 + $0x48] sm:$0xff] }
 0x840   :  { %1815 = vmatprep.subr.mxu1 %v2125_v0 }
 0x841   :  { %1816 = vmatpush3.msra.mxu1 %v2935_v12  ;;  %v2809_v12 = vld [vmem:[#allocation8 + $0x40] sm:$0xff] }
 0x842   :  { %1820 = vmatprep.subr.mxu1 %v2125_v0 }
 0x8e2   :  { %v929_v19 = vpop.f32.mrf.mxu1 }
 0x8e3   :  { %v933_v20 = vadd.f32 %v929_v19, %v776_v18  ;;  %v2833_v18 = vld [vmem:[#allocation8 + $0x10] sm:$0xff]  ;;  %v2837_v19 = vld [vmem:[#allocation8 + $0x8] sm:$0xff] }
 0x8e4   :  { %v1784_v21 = vpop.f32.mrf.mxu1 }
 0x8e5   :  { %1950 = vtanh.f32 %v933_v20  ;;  %v2841_v20 = vld [vmem:[#allocation8] sm:$0xff]  ;;  %v940_v21 = vld [vmem:[#allocation3 + $0x78] sm:$0xff] }
 0x8e6   :  { %2936 = vst [vmem:[#allocation13_spill] sm:$0xff] %v2841_v20 }
 0x8f2   :  { %v1951_v24 = vpop.eup %1950 }
 0x8f3   :  { %v937_v26 = vmul.f32 %v1951_v24, %v1949_v22 }
 0x8f5   :  { %v2680_v27 = vadd.f32 %v937_v26, %v936_v25  ;;  %v942_v26 = vld [vmem:[#allocation3 + $0x88] sm:$0xff] }
 0x8f7   :  { %1008 = vmatmul.mubr.f32.vlgmr.msra.gmra.mxu0 %v2680_v27 }
 0x8f8   :  { %1110 = vmatpush1.msra.mxu0 %v2683_v28  ;;  %1173 = vmatprep.mubr.f32.mxu0 %v2125_v0 }
 0x8f9   :  { %1111 = vmatprep.subr.mxu0 %v2687_v29 }
 0x8fa   :  { %1112 = vmatpush1.msra.mxu0 %v2690_v30 }
 0x8fb   :  { %1113 = vmatprep.subr.mxu0 %v2693_v31 }
 0x8fc   :  { %1114 = vmatpush1.msra.mxu0 %v2696_v32 }
 0x8fd   :  { %1115 = vmatprep.subr.mxu0 %v2699_v33 }
 0x8fe   :  { %1116 = vmatpush1.msra.mxu0 %v2702_v34 }
 0x8ff   :  { %1117 = vmatprep.subr.mxu0 %v2705_v35 }
 0x900   :  { %1118 = vmatpush1.msra.mxu0 %v2708_v36 }
 0x901   :  { %1119 = vmatprep.subr.mxu0 %v2711_v37 }
 0x902   :  { %1120 = vmatpush1.msra.mxu0 %v2714_v38 }
 0x903   :  { %1121 = vmatprep.subr.mxu0 %v2717_v39 }
 0x904   :  { %1122 = vmatpush1.msra.mxu0 %v2720_v40 }
 0x905   :  { %1123 = vmatprep.subr.mxu0 %v2723_v41 }
 0x906   :  { %1124 = vmatpush1.msra.mxu0 %v2726_v42 }
 0x907   :  { %1125 = vmatprep.subr.mxu0 %v2729_v43 }
 0x908   :  { %1126 = vmatpush1.msra.mxu0 %v2732_v44 }
 0x909   :  { %1127 = vmatprep.subr.mxu0 %v2735_v45 }
 0x90a   :  { %1128 = vmatpush1.msra.mxu0 %v2738_v46 }
 0x90b   :  { %1129 = vmatprep.subr.mxu0 %v2741_v59 }
 0x90c   :  { %1130 = vmatpush1.msra.mxu0 %v2744_v47 }
 0x90d   :  { %1131 = vmatprep.subr.mxu0 %v2747_v1 }
 0x90e   :  { %1132 = vmatpush1.msra.mxu0 %v2750_v52 }
 0x90f   :  { %1133 = vmatprep.subr.mxu0 %v2753_v53 }
 0x910   :  { %1134 = vmatpush1.msra.mxu0 %v2756_v54 }
 0x911   :  { %1135 = vmatprep.subr.mxu0 %v2759_v55 }
 0x912   :  { %1136 = vmatpush1.msra.mxu0 %v2762_v56 }
 0x913   :  { %1137 = vmatprep.subr.mxu0 %v2765_v57 }
 0x914   :  { %1138 = vmatpush1.msra.mxu0 %v2768_v58 }
 0x915   :  { %1139 = vmatprep.subr.mxu0 %v2771_v48 }
 0x916   :  { %1140 = vmatpush1.msra.mxu0 %v2774_v60 }
 0x917   :  { %1275 = vmatprep.subr.mxu0 %v2641_v2  ;;  %v2785_v2 = vld [vmem:[#allocation8 + $0x70] sm:$0xff] }
 0x9b7   :  { %v1009_v61 = vpop.f32.mrf.mxu0 }
 0x9b8   :  { %v1014_v22 = vadd.f32 %v1009_v61, %v940_v21 }
 0x9b9   :  { %v1011_v63 = vpop.f32.mrf.mxu0 }
 0x9ba   :  { %v1021_v50 = vadd.f32 %v1011_v63, %v941_v62  ;;  %v1468_v23 = vmul.f32 -1.442695, %v1014_v22 }
 0x9bc   :  { %v1469_v51 = vmul.f32 -1.442695, %v1021_v50 }
 0x9be   :  { %1952 = vpow2.f32 %v1469_v51 }
 0x9cb   :  { %v1953_v49 = vpop.eup %1952 }
 0x9cc   :  { %v1025_v3 = vadd.f32 1.0, %v1953_v49 }
 0x9ce   :  { %1954 = vrcp.f32 %v1025_v3 }
 0x9cf   :  { %1956 = vpow2.f32 %v1468_v23 }
 0x9db   :  { %v1955_v4 = vpop.eup %1954 }
 0x9dc   :  { %v1028_v5 = vmul.f32 %v1955_v4, %v2680_v27  ;;  %v1957_v24 = vpop.eup %1956 }
 0x9dd   :  { %v1018_v25 = vadd.f32 1.0, %v1957_v24 }
 0x9de   :  { %1818 = vmatmul.mubr.f32.vlgmr.msra.gmra.mxu1 %v1028_v5 }
 0x9df   :  { %1821 = vmatpush3.msra.mxu1 %v2779_v6  ;;  %1852 = vmatprep.mubr.msk.f32.mxu1 %vm2126_vm0, %v2125_v0  ;;  %1958 = vrcp.f32 %v1018_v25 }
 0x9e0   :  { %1822 = vmatprep.subr.mxu1 %v2125_v0 }
 0x9e1   :  { %1823 = vmatpush3.msra.mxu1 %v2785_v2 }
 0x9e2   :  { %1824 = vmatprep.subr.mxu1 %v2125_v0 }
 0x9e3   :  { %1825 = vmatpush3.msra.mxu1 %v2789_v7 }
 0x9e4   :  { %1826 = vmatprep.subr.mxu1 %v2125_v0 }
 0x9e5   :  { %1827 = vmatpush3.msra.mxu1 %v2793_v8 }
 0x9e6   :  { %1828 = vmatprep.subr.mxu1 %v2125_v0 }
 0x9e7   :  { %1829 = vmatpush3.msra.mxu1 %v2797_v9 }
 0x9e8   :  { %1830 = vmatprep.subr.mxu1 %v2125_v0 }
 0x9e9   :  { %1831 = vmatpush3.msra.mxu1 %v2801_v10 }
 0x9ea   :  { %1832 = vmatprep.subr.mxu1 %v2125_v0 }
 0x9eb   :  { %1833 = vmatpush3.msra.mxu1 %v2805_v11 }
 0x9ec   :  { %1834 = vmatprep.subr.mxu1 %v2125_v0  ;;  %v1959_v51 = vpop.eup %1958 }
 0x9ed   :  { %1835 = vmatpush3.msra.mxu1 %v2809_v12  ;;  %v1101_v49 = vsub.f32 1.0, %v1959_v51 }
 0x9ee   :  { %1836 = vmatprep.subr.mxu1 %v2125_v0 }
 0x9ef   :  { %1837 = vmatpush3.msra.mxu1 %v2813_v13  ;;  %v1102_v4 = vmul.f32 %v1101_v49, %v2680_v27 }
 0x9f0   :  { %1838 = vmatprep.subr.mxu1 %v2125_v0 }
 0x9f1   :  { %1839 = vmatpush3.msra.mxu1 %v2817_v14 }
 0x9f2   :  { %1840 = vmatprep.subr.mxu1 %v2125_v0 }
 0x9f3   :  { %1841 = vmatpush3.msra.mxu1 %v2821_v15 }
 0x9f4   :  { %1842 = vmatprep.subr.mxu1 %v2125_v0 }
 0x9f5   :  { %1843 = vmatpush3.msra.mxu1 %v2825_v16 }
 0x9f6   :  { %1844 = vmatprep.subr.mxu1 %v2125_v0 }
 0x9f7   :  { %1845 = vmatpush3.msra.mxu1 %v2829_v17 }
 0x9f8   :  { %1846 = vmatprep.subr.mxu1 %v2125_v0 }
 0x9f9   :  { %1847 = vmatpush3.msra.mxu1 %v2833_v18 }
 0x9fa   :  { %1848 = vmatprep.subr.mxu1 %v2125_v0 }
 0x9fb   :  { %1849 = vmatpush3.msra.mxu1 %v2837_v19 }
 0x9fc   :  { %1850 = vmatprep.subr.mxu1 %v2125_v0 }
 0x9fd   :  { %1851 = vmatpush3.msra.mxu1 %v2841_v20 }
 0x9fe   :  { %1855 = vmatprep.subr.mxu1 %v2125_v0 }
 0xa9e   :  { %v1095_v62 = vpop.f32.mrf.mxu1 }
 0xa9f   :  { %v1099_v63 = vadd.f32 %v1095_v62, %v942_v26 }
 0xaa0   :  { %v1819_v50 = vpop.f32.mrf.mxu1 }
 0xaa1   :  { %1960 = vtanh.f32 %v1099_v63 }
 0xaae   :  { %v1961_v3 = vpop.eup %1960 }
 0xaaf   :  { %v1103_v5 = vmul.f32 %v1961_v3, %v1959_v51 }
 0xab1   :  { %v2846_v20 = vadd.f32 %v1103_v5, %v1102_v4 }
 0xab3   :  { %1174 = vmatmul.mubr.f32.vlgmr.msra.gmra.mxu0 %v2846_v20 }
 0xab4   :  { %1276 = vmatpush1.msra.mxu0 %v2683_v28  ;;  %1339 = vmatprep.mubr.f32.mxu0 %v2125_v0  ;;  %v1107_v28 = vld [vmem:[#allocation3 + $0x98] sm:$0xff] }
 0xab5   :  { %1277 = vmatprep.subr.mxu0 %v2687_v29 }
 0xab6   :  { %1278 = vmatpush1.msra.mxu0 %v2690_v30 }
 0xab7   :  { %1279 = vmatprep.subr.mxu0 %v2693_v31 }
 0xab8   :  { %1280 = vmatpush1.msra.mxu0 %v2696_v32 }
 0xab9   :  { %1281 = vmatprep.subr.mxu0 %v2699_v33 }
 0xaba   :  { %1282 = vmatpush1.msra.mxu0 %v2702_v34 }
 0xabb   :  { %1283 = vmatprep.subr.mxu0 %v2705_v35 }
 0xabc   :  { %1284 = vmatpush1.msra.mxu0 %v2708_v36  ;;  %v2937_v36 = vld [vmem:[#allocation13_spill] sm:$0xff] }
 0xabd   :  { %1285 = vmatprep.subr.mxu0 %v2711_v37  ;;  %v1106_v37 = vld [vmem:[#allocation3 + $0x90] sm:$0xff] }
 0xabe   :  { %1286 = vmatpush1.msra.mxu0 %v2714_v38 }
 0xabf   :  { %1287 = vmatprep.subr.mxu0 %v2717_v39 }
 0xac0   :  { %1288 = vmatpush1.msra.mxu0 %v2720_v40 }
 0xac1   :  { %1289 = vmatprep.subr.mxu0 %v2723_v41 }
 0xac2   :  { %1290 = vmatpush1.msra.mxu0 %v2726_v42  ;;  %v1108_v42 = vld [vmem:[#allocation3 + $0xa0] sm:$0xff] }
 0xac3   :  { %1291 = vmatprep.subr.mxu0 %v2729_v43 }
 0xac4   :  { %1292 = vmatpush1.msra.mxu0 %v2732_v44 }
 0xac5   :  { %1293 = vmatprep.subr.mxu0 %v2735_v45 }
 0xac6   :  { %1294 = vmatpush1.msra.mxu0 %v2738_v46 }
 0xac7   :  { %1295 = vmatprep.subr.mxu0 %v2741_v59 }
 0xac8   :  { %1296 = vmatpush1.msra.mxu0 %v2744_v47 }
 0xac9   :  { %1297 = vmatprep.subr.mxu0 %v2747_v1 }
 0xaca   :  { %1298 = vmatpush1.msra.mxu0 %v2750_v52 }
 0xacb   :  { %1299 = vmatprep.subr.mxu0 %v2753_v53 }
 0xacc   :  { %1300 = vmatpush1.msra.mxu0 %v2756_v54  ;;  %v1273_v54 = vld [vmem:[#allocation3 + $0xb0] sm:$0xff] }
 0xacd   :  { %1301 = vmatprep.subr.mxu0 %v2759_v55 }
 0xace   :  { %1302 = vmatpush1.msra.mxu0 %v2762_v56 }
 0xacf   :  { %1303 = vmatprep.subr.mxu0 %v2765_v57 }
 0xad0   :  { %1304 = vmatpush1.msra.mxu0 %v2768_v58 }
 0xad1   :  { %1305 = vmatprep.subr.mxu0 %v2771_v48 }
 0xad2   :  { %1306 = vmatpush1.msra.mxu0 %v2774_v60 }
 0xb73   :  { %v1175_v27 = vpop.f32.mrf.mxu0 }
 0xb74   :  { %v1180_v38 = vadd.f32 %v1175_v27, %v1106_v37 }
 0xb75   :  { %v1177_v29 = vpop.f32.mrf.mxu0 }
 0xb76   :  { %v1187_v30 = vadd.f32 %v1177_v29, %v1107_v28  ;;  %v1470_v39 = vmul.f32 -1.442695, %v1180_v38 }
 0xb78   :  { %v1471_v31 = vmul.f32 -1.442695, %v1187_v30 }
 0xb7a   :  { %1962 = vpow2.f32 %v1471_v31 }
 0xb87   :  { %v1963_v32 = vpop.eup %1962 }
 0xb88   :  { %v1191_v33 = vadd.f32 1.0, %v1963_v32 }
 0xb8a   :  { %1964 = vrcp.f32 %v1191_v33 }
 0xb8b   :  { %1966 = vpow2.f32 %v1470_v39 }
 0xb97   :  { %v1965_v34 = vpop.eup %1964 }
 0xb98   :  { %v1194_v35 = vmul.f32 %v1965_v34, %v2846_v20  ;;  %v1967_v40 = vpop.eup %1966 }
 0xb99   :  { %v1184_v41 = vadd.f32 1.0, %v1967_v40 }
 0xb9a   :  { %1853 = vmatmul.mubr.f32.vlgmr.msra.gmra.mxu1 %v1194_v35 }
 0xb9b   :  { %1856 = vmatpush3.msra.mxu1 %v2779_v6  ;;  %1887 = vmatprep.mubr.msk.f32.mxu1 %vm2126_vm0, %v2125_v0  ;;  %1968 = vrcp.f32 %v1184_v41  ;;  %v1272_v6 = vld [vmem:[#allocation3 + $0xa8] sm:$0xff] }
 0xb9c   :  { %1857 = vmatprep.subr.mxu1 %v2125_v0 }
 0xb9d   :  { %1858 = vmatpush3.msra.mxu1 %v2785_v2 }
 0xb9e   :  { %1859 = vmatprep.subr.mxu1 %v2125_v0 }
 0xb9f   :  { %1860 = vmatpush3.msra.mxu1 %v2789_v7 }
 0xba0   :  { %1861 = vmatprep.subr.mxu1 %v2125_v0 }
 0xba1   :  { %1862 = vmatpush3.msra.mxu1 %v2793_v8 }
 0xba2   :  { %1863 = vmatprep.subr.mxu1 %v2125_v0 }
 0xba3   :  { %1864 = vmatpush3.msra.mxu1 %v2797_v9 }
 0xba4   :  { %1865 = vmatprep.subr.mxu1 %v2125_v0 }
 0xba5   :  { %1866 = vmatpush3.msra.mxu1 %v2801_v10  ;;  %v1274_v10 = vld [vmem:[#allocation3 + $0xb8] sm:$0xff] }
 0xba6   :  { %1867 = vmatprep.subr.mxu1 %v2125_v0 }
 0xba7   :  { %1868 = vmatpush3.msra.mxu1 %v2805_v11 }
 0xba8   :  { %1869 = vmatprep.subr.mxu1 %v2125_v0  ;;  %v1969_v46 = vpop.eup %1968 }
 0xba9   :  { %1870 = vmatpush3.msra.mxu1 %v2809_v12  ;;  %v1267_v59 = vsub.f32 1.0, %v1969_v46 }
 0xbaa   :  { %1871 = vmatprep.subr.mxu1 %v2125_v0 }
 0xbab   :  { %1872 = vmatpush3.msra.mxu1 %v2813_v13  ;;  %v1268_v1 = vmul.f32 %v1267_v59, %v2846_v20 }
 0xbac   :  { %1873 = vmatprep.subr.mxu1 %v2125_v0 }
 0xbad   :  { %1874 = vmatpush3.msra.mxu1 %v2817_v14 }
 0xbae   :  { %1875 = vmatprep.subr.mxu1 %v2125_v0 }
 0xbaf   :  { %1876 = vmatpush3.msra.mxu1 %v2821_v15 }
 0xbb0   :  { %1877 = vmatprep.subr.mxu1 %v2125_v0 }
 0xbb1   :  { %1878 = vmatpush3.msra.mxu1 %v2825_v16 }
 0xbb2   :  { %1879 = vmatprep.subr.mxu1 %v2125_v0 }
 0xbb3   :  { %1880 = vmatpush3.msra.mxu1 %v2829_v17 }
 0xbb4   :  { %1881 = vmatprep.subr.mxu1 %v2125_v0 }
 0xbb5   :  { %1882 = vmatpush3.msra.mxu1 %v2833_v18 }
 0xbb6   :  { %1883 = vmatprep.subr.mxu1 %v2125_v0 }
 0xbb7   :  { %1884 = vmatpush3.msra.mxu1 %v2837_v19 }
 0xbb8   :  { %1885 = vmatprep.subr.mxu1 %v2125_v0 }
 0xbb9   :  { %1886 = vmatpush3.msra.mxu1 %v2937_v36 }
 0xc5a   :  { %v1261_v43 = vpop.f32.mrf.mxu1 }
 0xc5b   :  { %v1265_v44 = vadd.f32 %v1261_v43, %v1108_v42 }
 0xc5c   :  { %v1854_v45 = vpop.f32.mrf.mxu1 }
 0xc5d   :  { %1970 = vtanh.f32 %v1265_v44 }
 0xc6a   :  { %v1971_v47 = vpop.eup %1970 }
 0xc6b   :  { %v1269_v0 = vmul.f32 %v1971_v47, %v1969_v46 }
 0xc6d   :  { %v1270_v52 = vadd.f32 %v1269_v0, %v1268_v1 }
 0xc6f   :  { %1340 = vmatmul.mubr.f32.vlgmr.msra.gmra.mxu0 %v1270_v52 }
 0xd2f   :  { %v1341_v53 = vpop.f32.mrf.mxu0 }
 0xd30   :  { %v1346_v2 = vadd.f32 %v1341_v53, %v1272_v6 }
 0xd31   :  { %v1343_v55 = vpop.f32.mrf.mxu0 }
 0xd32   :  { %v1353_v56 = vadd.f32 %v1343_v55, %v1273_v54  ;;  %v1472_v7 = vmul.f32 -1.442695, %v1346_v2 }
 0xd34   :  { %v1473_v57 = vmul.f32 -1.442695, %v1353_v56 }
 0xd36   :  { %1972 = vpow2.f32 %v1473_v57 }
 0xd43   :  { %v1973_v58 = vpop.eup %1972 }
 0xd44   :  { %v1357_v48 = vadd.f32 1.0, %v1973_v58 }
 0xd46   :  { %1974 = vrcp.f32 %v1357_v48 }
 0xd47   :  { %1976 = vpow2.f32 %v1472_v7 }
 0xd53   :  { %v1975_v60 = vpop.eup %1974 }
 0xd54   :  { %v1360_v61 = vmul.f32 %v1975_v60, %v1270_v52  ;;  %v1977_v8 = vpop.eup %1976 }
 0xd55   :  { %v1350_v9 = vadd.f32 1.0, %v1977_v8 }
 0xd56   :  { %1888 = vmatmul.mubr.f32.vlgmr.msra.gmra.mxu1 %v1360_v61 }
 0xd57   :  { %1978 = vrcp.f32 %v1350_v9 }
 0xd64   :  { %v1979_v14 = vpop.eup %1978 }
 0xd65   :  { %v1433_v15 = vsub.f32 1.0, %v1979_v14 }
 0xd67   :  { %v1434_v17 = vmul.f32 %v1433_v15, %v1270_v52 }
 0xe16   :  { %v1427_v11 = vpop.f32.mrf.mxu1 }
 0xe17   :  { %v1431_v12 = vadd.f32 %v1427_v11, %v1274_v10 }
 0xe18   :  { %v1889_v13 = vpop.f32.mrf.mxu1 }
 0xe19   :  { %1980 = vtanh.f32 %v1431_v12 }
 0xe26   :  { %v1981_v16 = vpop.eup %1980 }
 0xe27   :  { %v1435_v18 = vmul.f32 %v1981_v16, %v1979_v14 }
 0xe29   :  { %v1436_v19 = vadd.f32 %v1435_v18, %v1434_v17 }
 0xe2b   :  { %1441 = vst [vmem:[#allocation9] sm:$0xff] %v1436_v19 }
 0xe2c   :  { %2101 = shalt.err (!%p2098_p5)
}
 0xe2d   :  { %1451 = dma.vmem_to_hbm [thread:$0]  %s1449_s2, 128, %s2922_s3, [#allocation5]  }
 0xe2e   :  { %2114 = dma.done.wait [#allocation5], 128  }
 0xe2f   :  { %2115 = vsyncadd [#allocation5], 4294967168 }
 0xe30   :  { %1455 = vsyncpa [#allocation4], 1 }
 0xe31   :  { %1456 = vsyncpa [#allocation7], 1 }
 0xe32   :  { %1457 = vsyncpa [#allocation5], 1 }

</bundles_post_ra>
